<compile_context>
chip_gen: v7x
topology: tpu7x:2x2x1
jax: 0.10.0
libtpu: 0.0.40
codegen_flags: <defaults>
</compile_context>

<pallas_src>
import functools
import numpy as np

import jax
import jax.numpy as jnp
from jax import lax
from jax.experimental import pallas as pl
from jax.experimental.pallas import tpu as pltpu

_TAPS = tuple((dh, dw) for dh in (-1, 0, 1) for dw in (-1, 0, 1))
_BN_EPS = 1e-5
_REF_PREC = lax.Precision.HIGHEST          # reference only (near-exact math)


def _bilinear_taps(n_in: int):
    """Per-output-row (index, weight) pairs for x2 bilinear upsampling,
    PyTorch nn.Upsample(scale_factor=2, mode='bilinear', align_corners=False)."""
    taps = []
    for o in range(2 * n_in):
        src = max((o + 0.5) / 2.0 - 0.5, 0.0)
        i0 = int(np.floor(src))
        frac = src - i0
        i0c = min(i0, n_in - 1)
        i1c = min(i0 + 1, n_in - 1)
        if i1c == i0c:
            taps.append(((i0c, 1.0), (i0c, 0.0)))
        else:
            taps.append(((i0c, 1.0 - frac), (i1c, frac)))
    return tuple(taps)


def _bilinear_matrix(n_in: int) -> np.ndarray:
    """1-D x2 bilinear upsample operator (used for the W axis / reference)."""
    u = np.zeros((2 * n_in, n_in), np.float32)
    for o, ((i0, a0), (i1, a1)) in enumerate(_bilinear_taps(n_in)):
        u[o, i0] += a0
        u[o, i1] += a1
    return u


def _tap_masks(h2: int, w2: int) -> np.ndarray:
    """(9, h2*w2) validity masks implementing zero padding for each 3x3 tap."""
    m = np.zeros((9, h2 * w2), np.float32)
    for t, (dh, dw) in enumerate(_TAPS):
        valid = np.zeros((h2, w2), np.float32)
        valid[max(0, -dh):min(h2, h2 - dh), max(0, -dw):min(w2, w2 - dw)] = 1.0
        m[t] = valid.reshape(-1)
    return m


def _make_upblock_kernel(func, cin, cmid, cout, h_in, w_in, up_taps):
    h2, w2 = 2 * h_in, 2 * w_in

    def kernel(x_ref, uwt_ref, mask_ref, w1_ref, w2_ref, t1_ref, t2_ref,
               o_ref, xu_ref, stk1_ref, stk2_ref):
        # ---------------- separable bilinear x2 upsample ----------------
        # W axis on the MXU: (H*Cin, W) @ (W, 2W), DEFAULT (bf16) precision.
        xw = jnp.dot(x_ref[0].astype(jnp.float32), uwt_ref[...],
                     preferred_element_type=jnp.float32)            # (H*Cin, 2W)
        rows = [xw[i * cin:(i + 1) * cin, :] for i in range(h_in)]   # (Cin, 2W)
        # H axis: <=2-tap weighted adds per output row, written lane-dense into
        # the (Cin, S2) scratch (also performs the sublane->lane relayout).
        for p in range(h2):
            (i0, a0), (i1, a1) = up_taps[p]
            r = a0 * rows[i0]
            if a1 != 0.0:
                r = r + a1 * rows[i1]
            xu_ref[:, p * w2:(p + 1) * w2] = r

        masks = mask_ref[...]                                        # (9, S2)

        def im2col(act, stk_ref, c):
            # Stack the 9 shifted / zero-padded taps along K so each conv is a
            # SINGLE MXU matmul with K = 9*C instead of 9 K=C matmuls.
            for t, (dh, dw) in enumerate(_TAPS):
                sft = dh * w2 + dw
                v = act if sft == 0 else jnp.roll(act, -sft, axis=1)
                if sft != 0:
                    v = v * masks[t:t + 1, :]                        # zero padding
                stk_ref[t * c:(t + 1) * c, :] = v
            return stk_ref[...]

        # conv1 (bias + BN1 scale folded into weights, offset in t1) + ReLU
        x1 = im2col(xu_ref[...], stk1_ref, cin)                      # (9*Cin, S2)
        h1 = jnp.dot(w1_ref[...], x1, preferred_element_type=jnp.float32)
        h1 = jnp.maximum(h1 + t1_ref[...], 0.0)
        # conv2 (bias [+ BN2 scale] folded) + optional activation
        x2 = im2col(h1, stk2_ref, cmid)                              # (9*Cmid, S2)
        y = jnp.dot(w2_ref[...], x2, preferred_element_type=jnp.float32)
        y = y + t2_ref[...]
        if func == 'tanh':
            y = jnp.tanh(y)
        elif func == 'relu':
            y = jnp.maximum(y, 0.0)
        o_ref[0] = y.astype(o_ref.dtype)

    return kernel


@functools.partial(jax.jit, static_argnames='func')
def upblock_forward(x, params, func='tanh'):
    """Forward of UpBlock on NCHW input x using one fused Pallas kernel."""
    b, cin, h, w = x.shape
    h2, w2 = 2 * h, 2 * w
    s2 = h2 * w2
    w1, b1 = params['w1'], params['b1']        # (Cmid, Cin, 3, 3), (Cmid,)
    w2w, b2 = params['w2'], params['b2']       # (Cout, Cmid, 3, 3), (Cout,)
    cmid, cout = w1.shape[0], w2w.shape[0]

    # ---- trace-time constants ----
    uwt = jnp.asarray(_bilinear_matrix(w).T)                       # (W, 2W)
    up_taps = _bilinear_taps(h)                                    # static taps
    masks = jnp.asarray(_tap_masks(h2, w2))                        # (9, S2)

    # Fold conv bias + inference BatchNorm into per-output-channel scale/offset,
    # then fold the scale directly into the conv weights (no in-kernel scale mul).
    s1 = params['g1'] / jnp.sqrt(params['v1'] + _BN_EPS)
    t1 = (b1 - params['m1']) * s1 + params['be1']
    if func in ('tanh', 'relu'):
        s2a = params['g2'] / jnp.sqrt(params['v2'] + _BN_EPS)
        t2 = (b2 - params['m2']) * s2a + params['be2']
    else:                                   # func == 'None': conv2 + bias only
        s2a = jnp.ones_like(b2)
        t2 = b2

    w1_taps = jnp.stack([w1[:, :, dh + 1, dw + 1] for dh, dw in _TAPS], 0)   # (9,Cmid,Cin)
    w2_taps = jnp.stack([w2w[:, :, dh + 1, dw + 1] for dh, dw in _TAPS], 0)  # (9,Cout,Cmid)
    w1_stk = (w1_taps.transpose(1, 0, 2).reshape(cmid, 9 * cin)
              * s1[:, None]).astype(jnp.float32)                   # (Cmid, 9*Cin)
    w2_stk = (w2_taps.transpose(1, 0, 2).reshape(cout, 9 * cmid)
              * s2a[:, None]).astype(jnp.float32)                  # (Cout, 9*Cmid)
    t1 = t1.reshape(cmid, 1).astype(jnp.float32)
    t2 = t2.reshape(cout, 1).astype(jnp.float32)

    # (B, Cin, H, W) -> (B, H*Cin, W): image rows stay contiguous in sublanes so
    # the in-kernel H-upsample takes cheap static sublane slices.
    x_rows = x.transpose(0, 2, 1, 3).reshape(b, h * cin, w)

    out = pl.pallas_call(
        _make_upblock_kernel(func, cin, cmid, cout, h, w, up_taps),
        out_shape=jax.ShapeDtypeStruct((b, cout, s2), x.dtype),
        grid=(b,),
        in_specs=[
            pl.BlockSpec((1, h * cin, w), lambda i: (i, 0, 0)),   # input rows
            pl.BlockSpec((w, w2), lambda i: (0, 0)),              # Uw^T
            pl.BlockSpec((9, s2), lambda i: (0, 0)),              # tap masks
            pl.BlockSpec((cmid, 9 * cin), lambda i: (0, 0)),      # conv1 (BN folded)
            pl.BlockSpec((cout, 9 * cmid), lambda i: (0, 0)),     # conv2 (BN folded)
            pl.BlockSpec((cmid, 1), lambda i: (0, 0)),            # bias/offset 1
            pl.BlockSpec((cout, 1), lambda i: (0, 0)),            # bias/offset 2
        ],
        out_specs=pl.BlockSpec((1, cout, s2), lambda i: (i, 0, 0)),
        scratch_shapes=[
            pltpu.VMEM((cin, s2), jnp.float32),        # upsampled activation
            pltpu.VMEM((9 * cin, s2), jnp.float32),    # conv1 im2col stack
            pltpu.VMEM((9 * cmid, s2), jnp.float32),   # conv2 im2col stack
        ],
        compiler_params=pltpu.CompilerParams(
            dimension_semantics=("parallel",),
            # actual working set is < 2 MiB; leave headroom for spills.
            vmem_limit_bytes=16 * 1024 * 1024),
    )(x_rows, uwt, masks, w1_stk, w2_stk, t1, t2)
    return out.reshape(b, cout, h2, w2)


def upblock_reference(x, p, func='tanh'):
    """Pure-JAX reference (NCHW, eval mode), near-exact (HIGHEST) precision."""
    _, _, h, w = x.shape
    uh, uw = jnp.asarray(_bilinear_matrix(h)), jnp.asarray(_bilinear_matrix(w))
    xu = jnp.einsum('ph,bchw,qw->bcpq', uh, x, uw, precision=_REF_PREC)
    dn = ('NCHW', 'OIHW', 'NCHW')

    def bn(y, g, be, m, v):
        sc = (g / jnp.sqrt(v + _BN_EPS))[None, :, None, None]
        return (y - m[None, :, None, None]) * sc + be[None, :, None, None]

    y = lax.conv_general_dilated(xu, p['w1'], (1, 1), ((1, 1), (1, 1)),
                                 dimension_numbers=dn, precision=_REF_PREC)
    y = y + p['b1'][None, :, None, None]
    y = jnp.maximum(bn(y, p['g1'], p['be1'], p['m1'], p['v1']), 0.0)
    y = lax.conv_general_dilated(y, p['w2'], (1, 1), ((1, 1), (1, 1)),
                                 dimension_numbers=dn, precision=_REF_PREC)
    y = y + p['b2'][None, :, None, None]
    if func in ('tanh', 'relu'):
        y = bn(y, p['g2'], p['be2'], p['m2'], p['v2'])
        y = jnp.tanh(y) if func == 'tanh' else jnp.maximum(y, 0.0)
    return y


if __name__ == "__main__":
    key = jax.random.PRNGKey(0)
    B, Cin, H, W = 2, 4, 16, 16
    Cout = 8
    ks = jax.random.split(key, 12)
    x = jax.random.normal(ks[0], (B, Cin, H, W), jnp.float32)
    params = dict(
        w1=0.2 * jax.random.normal(ks[1], (Cout, Cin, 3, 3), jnp.float32),
        b1=0.1 * jax.random.normal(ks[2], (Cout,), jnp.float32),
        w2=0.2 * jax.random.normal(ks[3], (Cout, Cout, 3, 3), jnp.float32),
        b2=0.1 * jax.random.normal(ks[4], (Cout,), jnp.float32),
        g1=1.0 + 0.1 * jax.random.normal(ks[5], (Cout,), jnp.float32),
        be1=0.1 * jax.random.normal(ks[6], (Cout,), jnp.float32),
        m1=0.1 * jax.random.normal(ks[7], (Cout,), jnp.float32),
        v1=1.0 + 0.1 * jax.random.uniform(ks[8], (Cout,), jnp.float32),
        g2=1.0 + 0.1 * jax.random.normal(ks[9], (Cout,), jnp.float32),
        be2=0.1 * jax.random.normal(ks[10], (Cout,), jnp.float32),
        m2=0.1 * jax.random.normal(ks[11], (Cout,), jnp.float32),
        v2=jnp.ones((Cout,), jnp.float32),
    )
    func = 'tanh'

    out = jax.block_until_ready(upblock_forward(x, params, func=func))
    ref = jax.block_until_ready(upblock_reference(x, params, func=func))

    assert out.shape == (B, Cout, 2 * H, 2 * W)
    assert out.dtype == x.dtype
    # Kernel uses DEFAULT (bf16-MXU) matmul precision per the perf review; the
    # reference is near-exact f32, so allow bf16-rounding-scale differences.
    err = jnp.abs(out - ref)
    max_err = float(jnp.max(err))
    rms_err = float(jnp.sqrt(jnp.mean(err * err)))
    assert max_err < 5e-2 and rms_err < 1e-2, f"max|err|={max_err}, rms={rms_err}"
    print("KERNEL_OK")
</pallas_src>

<mosaic_0001>
module attributes {stable_mosaic.version = 11 : i64} {
  func.func @kernel(%arg0: i32, %arg1: memref<1x64x16xf32, #tpu.memory_space<vmem>>, %arg2: memref<16x32xf32, #tpu.memory_space<vmem>>, %arg3: memref<9x1024xf32, #tpu.memory_space<vmem>>, %arg4: memref<8x36xf32, #tpu.memory_space<vmem>>, %arg5: memref<8x72xf32, #tpu.memory_space<vmem>>, %arg6: memref<8x1xf32, #tpu.memory_space<vmem>>, %arg7: memref<8x1xf32, #tpu.memory_space<vmem>>, %arg8: memref<1x8x1024xf32, #tpu.memory_space<vmem>>, %arg9: memref<4x1024xf32, #tpu.memory_space<vmem>>, %arg10: memref<36x1024xf32, #tpu.memory_space<vmem>>, %arg11: memref<72x1024xf32, #tpu.memory_space<vmem>>) attributes {dimension_semantics = [#tpu.dimension_semantics<parallel>], iteration_bounds = array<i64: 2>, scalar_prefetch = 0 : i64, scratch_operands = 3 : i64, tpu.core_type = #tpu.core_type<tc>, window_params = [{transform_indices = @transform_0, window_bounds = array<i64: 1, 64, 16>}, {pipeline_mode = #tpu.pipeline_mode<synchronous>, transform_indices = @transform_1, window_bounds = array<i64: 16, 32>}, {pipeline_mode = #tpu.pipeline_mode<synchronous>, transform_indices = @transform_2, window_bounds = array<i64: 9, 1024>}, {pipeline_mode = #tpu.pipeline_mode<synchronous>, transform_indices = @transform_3, window_bounds = array<i64: 8, 36>}, {pipeline_mode = #tpu.pipeline_mode<synchronous>, transform_indices = @transform_4, window_bounds = array<i64: 8, 72>}, {pipeline_mode = #tpu.pipeline_mode<synchronous>, transform_indices = @transform_5, window_bounds = array<i64: 8, 1>}, {pipeline_mode = #tpu.pipeline_mode<synchronous>, transform_indices = @transform_6, window_bounds = array<i64: 8, 1>}, {transform_indices = @transform_7, window_bounds = array<i64: 1, 8, 1024>}]} {
    %c0 = arith.constant 0 : index
    %c0_0 = arith.constant 0 : index
    %c0_1 = arith.constant 0 : index
    %0 = vector.load %arg1[%c0, %c0_0, %c0_1] : memref<1x64x16xf32, #tpu.memory_space<vmem>>, vector<1x64x16xf32>
    %1 = vector.shape_cast %0 : vector<1x64x16xf32> to vector<64x16xf32>
    %c0_2 = arith.constant 0 : index
    %c0_3 = arith.constant 0 : index
    %2 = vector.load %arg2[%c0_2, %c0_3] : memref<16x32xf32, #tpu.memory_space<vmem>>, vector<16x32xf32>
    %cst = arith.constant dense<0.000000e+00> : vector<64x32xf32>
    %3 = tpu.matmul %1, %2, %cst {dimension_numbers = #tpu.dot_dimension_numbers<[1], [0], [0], [1], [0, 0, 1, 1], [], []>} : vector<64x16xf32>, vector<16x32xf32>, vector<64x32xf32> -> vector<64x32xf32>
    %4 = vector.extract_strided_slice %3 {offsets = [0, 0], sizes = [4, 32], strides = [1, 1]} : vector<64x32xf32> to vector<4x32xf32>
    %5 = vector.extract_strided_slice %3 {offsets = [4, 0], sizes = [4, 32], strides = [1, 1]} : vector<64x32xf32> to vector<4x32xf32>
    %6 = vector.extract_strided_slice %3 {offsets = [8, 0], sizes = [4, 32], strides = [1, 1]} : vector<64x32xf32> to vector<4x32xf32>
    %7 = vector.extract_strided_slice %3 {offsets = [12, 0], sizes = [4, 32], strides = [1, 1]} : vector<64x32xf32> to vector<4x32xf32>
    %8 = vector.extract_strided_slice %3 {offsets = [16, 0], sizes = [4, 32], strides = [1, 1]} : vector<64x32xf32> to vector<4x32xf32>
    %9 = vector.extract_strided_slice %3 {offsets = [20, 0], sizes = [4, 32], strides = [1, 1]} : vector<64x32xf32> to vector<4x32xf32>
    %10 = vector.extract_strided_slice %3 {offsets = [24, 0], sizes = [4, 32], strides = [1, 1]} : vector<64x32xf32> to vector<4x32xf32>
    %11 = vector.extract_strided_slice %3 {offsets = [28, 0], sizes = [4, 32], strides = [1, 1]} : vector<64x32xf32> to vector<4x32xf32>
    %12 = vector.extract_strided_slice %3 {offsets = [32, 0], sizes = [4, 32], strides = [1, 1]} : vector<64x32xf32> to vector<4x32xf32>
    %13 = vector.extract_strided_slice %3 {offsets = [36, 0], sizes = [4, 32], strides = [1, 1]} : vector<64x32xf32> to vector<4x32xf32>
    %14 = vector.extract_strided_slice %3 {offsets = [40, 0], sizes = [4, 32], strides = [1, 1]} : vector<64x32xf32> to vector<4x32xf32>
    %15 = vector.extract_strided_slice %3 {offsets = [44, 0], sizes = [4, 32], strides = [1, 1]} : vector<64x32xf32> to vector<4x32xf32>
    %16 = vector.extract_strided_slice %3 {offsets = [48, 0], sizes = [4, 32], strides = [1, 1]} : vector<64x32xf32> to vector<4x32xf32>
    %17 = vector.extract_strided_slice %3 {offsets = [52, 0], sizes = [4, 32], strides = [1, 1]} : vector<64x32xf32> to vector<4x32xf32>
    %18 = vector.extract_strided_slice %3 {offsets = [56, 0], sizes = [4, 32], strides = [1, 1]} : vector<64x32xf32> to vector<4x32xf32>
    %19 = vector.extract_strided_slice %3 {offsets = [60, 0], sizes = [4, 32], strides = [1, 1]} : vector<64x32xf32> to vector<4x32xf32>
    %cst_4 = arith.constant 1.000000e+00 : f32
    %20 = vector.broadcast %cst_4 : f32 to vector<4x32xf32>
    %21 = arith.mulf %20, %4 : vector<4x32xf32>
    %c0_5 = arith.constant 0 : index
    %c0_6 = arith.constant 0 : index
    %22 = vector.load %arg9[%c0_5, %c0_6] : memref<4x1024xf32, #tpu.memory_space<vmem>>, vector<4x32xf32>
    tpu.vector_store %arg9[%c0_5, %c0_6], %21 {strides = array<i32>} : memref<4x1024xf32, #tpu.memory_space<vmem>>, vector<4x32xf32>,
    %cst_7 = arith.constant 7.500000e-01 : f32
    %23 = vector.broadcast %cst_7 : f32 to vector<4x32xf32>
    %24 = arith.mulf %23, %4 : vector<4x32xf32>
    %cst_8 = arith.constant 2.500000e-01 : f32
    %25 = vector.broadcast %cst_8 : f32 to vector<4x32xf32>
    %26 = arith.mulf %25, %5 : vector<4x32xf32>
    %27 = arith.addf %24, %26 : vector<4x32xf32>
    %c0_9 = arith.constant 0 : index
    %c32 = arith.constant 32 : index
    %28 = vector.load %arg9[%c0_9, %c32] : memref<4x1024xf32, #tpu.memory_space<vmem>>, vector<4x32xf32>
    tpu.vector_store %arg9[%c0_9, %c32], %27 {strides = array<i32>} : memref<4x1024xf32, #tpu.memory_space<vmem>>, vector<4x32xf32>,
    %cst_10 = arith.constant 2.500000e-01 : f32
    %29 = vector.broadcast %cst_10 : f32 to vector<4x32xf32>
    %30 = arith.mulf %29, %4 : vector<4x32xf32>
    %cst_11 = arith.constant 7.500000e-01 : f32
    %31 = vector.broadcast %cst_11 : f32 to vector<4x32xf32>
    %32 = arith.mulf %31, %5 : vector<4x32xf32>
    %33 = arith.addf %30, %32 : vector<4x32xf32>
    %c0_12 = arith.constant 0 : index
    %c64 = arith.constant 64 : index
    %34 = vector.load %arg9[%c0_12, %c64] : memref<4x1024xf32, #tpu.memory_space<vmem>>, vector<4x32xf32>
    tpu.vector_store %arg9[%c0_12, %c64], %33 {strides = array<i32>} : memref<4x1024xf32, #tpu.memory_space<vmem>>, vector<4x32xf32>,
    %cst_13 = arith.constant 7.500000e-01 : f32
    %35 = vector.broadcast %cst_13 : f32 to vector<4x32xf32>
    %36 = arith.mulf %35, %5 : vector<4x32xf32>
    %cst_14 = arith.constant 2.500000e-01 : f32
    %37 = vector.broadcast %cst_14 : f32 to vector<4x32xf32>
    %38 = arith.mulf %37, %6 : vector<4x32xf32>
    %39 = arith.addf %36, %38 : vector<4x32xf32>
    %c0_15 = arith.constant 0 : index
    %c96 = arith.constant 96 : index
    %40 = vector.load %arg9[%c0_15, %c96] : memref<4x1024xf32, #tpu.memory_space<vmem>>, vector<4x32xf32>
    tpu.vector_store %arg9[%c0_15, %c96], %39 {strides = array<i32>} : memref<4x1024xf32, #tpu.memory_space<vmem>>, vector<4x32xf32>,
    %cst_16 = arith.constant 2.500000e-01 : f32
    %41 = vector.broadcast %cst_16 : f32 to vector<4x32xf32>
    %42 = arith.mulf %41, %5 : vector<4x32xf32>
    %cst_17 = arith.constant 7.500000e-01 : f32
    %43 = vector.broadcast %cst_17 : f32 to vector<4x32xf32>
    %44 = arith.mulf %43, %6 : vector<4x32xf32>
    %45 = arith.addf %42, %44 : vector<4x32xf32>
    %c0_18 = arith.constant 0 : index
    %c128 = arith.constant 128 : index
    %46 = vector.load %arg9[%c0_18, %c128] : memref<4x1024xf32, #tpu.memory_space<vmem>>, vector<4x32xf32>
    tpu.vector_store %arg9[%c0_18, %c128], %45 {strides = array<i32>} : memref<4x1024xf32, #tpu.memory_space<vmem>>, vector<4x32xf32>,
    %cst_19 = arith.constant 7.500000e-01 : f32
    %47 = vector.broadcast %cst_19 : f32 to vector<4x32xf32>
    %48 = arith.mulf %47, %6 : vector<4x32xf32>
    %cst_20 = arith.constant 2.500000e-01 : f32
    %49 = vector.broadcast %cst_20 : f32 to vector<4x32xf32>
    %50 = arith.mulf %49, %7 : vector<4x32xf32>
    %51 = arith.addf %48, %50 : vector<4x32xf32>
    %c0_21 = arith.constant 0 : index
    %c160 = arith.constant 160 : index
    %52 = vector.load %arg9[%c0_21, %c160] : memref<4x1024xf32, #tpu.memory_space<vmem>>, vector<4x32xf32>
    tpu.vector_store %arg9[%c0_21, %c160], %51 {strides = array<i32>} : memref<4x1024xf32, #tpu.memory_space<vmem>>, vector<4x32xf32>,
    %cst_22 = arith.constant 2.500000e-01 : f32
    %53 = vector.broadcast %cst_22 : f32 to vector<4x32xf32>
    %54 = arith.mulf %53, %6 : vector<4x32xf32>
    %cst_23 = arith.constant 7.500000e-01 : f32
    %55 = vector.broadcast %cst_23 : f32 to vector<4x32xf32>
    %56 = arith.mulf %55, %7 : vector<4x32xf32>
    %57 = arith.addf %54, %56 : vector<4x32xf32>
    %c0_24 = arith.constant 0 : index
    %c192 = arith.constant 192 : index
    %58 = vector.load %arg9[%c0_24, %c192] : memref<4x1024xf32, #tpu.memory_space<vmem>>, vector<4x32xf32>
    tpu.vector_store %arg9[%c0_24, %c192], %57 {strides = array<i32>} : memref<4x1024xf32, #tpu.memory_space<vmem>>, vector<4x32xf32>,
    %cst_25 = arith.constant 7.500000e-01 : f32
    %59 = vector.broadcast %cst_25 : f32 to vector<4x32xf32>
    %60 = arith.mulf %59, %7 : vector<4x32xf32>
    %cst_26 = arith.constant 2.500000e-01 : f32
    %61 = vector.broadcast %cst_26 : f32 to vector<4x32xf32>
    %62 = arith.mulf %61, %8 : vector<4x32xf32>
    %63 = arith.addf %60, %62 : vector<4x32xf32>
    %c0_27 = arith.constant 0 : index
    %c224 = arith.constant 224 : index
    %64 = vector.load %arg9[%c0_27, %c224] : memref<4x1024xf32, #tpu.memory_space<vmem>>, vector<4x32xf32>
    tpu.vector_store %arg9[%c0_27, %c224], %63 {strides = array<i32>} : memref<4x1024xf32, #tpu.memory_space<vmem>>, vector<4x32xf32>,
    %cst_28 = arith.constant 2.500000e-01 : f32
    %65 = vector.broadcast %cst_28 : f32 to vector<4x32xf32>
    %66 = arith.mulf %65, %7 : vector<4x32xf32>
    %cst_29 = arith.constant 7.500000e-01 : f32
    %67 = vector.broadcast %cst_29 : f32 to vector<4x32xf32>
    %68 = arith.mulf %67, %8 : vector<4x32xf32>
    %69 = arith.addf %66, %68 : vector<4x32xf32>
    %c0_30 = arith.constant 0 : index
    %c256 = arith.constant 256 : index
    %70 = vector.load %arg9[%c0_30, %c256] : memref<4x1024xf32, #tpu.memory_space<vmem>>, vector<4x32xf32>
    tpu.vector_store %arg9[%c0_30, %c256], %69 {strides = array<i32>} : memref<4x1024xf32, #tpu.memory_space<vmem>>, vector<4x32xf32>,
    %cst_31 = arith.constant 7.500000e-01 : f32
    %71 = vector.broadcast %cst_31 : f32 to vector<4x32xf32>
    %72 = arith.mulf %71, %8 : vector<4x32xf32>
    %cst_32 = arith.constant 2.500000e-01 : f32
    %73 = vector.broadcast %cst_32 : f32 to vector<4x32xf32>
    %74 = arith.mulf %73, %9 : vector<4x32xf32>
    %75 = arith.addf %72, %74 : vector<4x32xf32>
    %c0_33 = arith.constant 0 : index
    %c288 = arith.constant 288 : index
    %76 = vector.load %arg9[%c0_33, %c288] : memref<4x1024xf32, #tpu.memory_space<vmem>>, vector<4x32xf32>
    tpu.vector_store %arg9[%c0_33, %c288], %75 {strides = array<i32>} : memref<4x1024xf32, #tpu.memory_space<vmem>>, vector<4x32xf32>,
    %cst_34 = arith.constant 2.500000e-01 : f32
    %77 = vector.broadcast %cst_34 : f32 to vector<4x32xf32>
    %78 = arith.mulf %77, %8 : vector<4x32xf32>
    %cst_35 = arith.constant 7.500000e-01 : f32
    %79 = vector.broadcast %cst_35 : f32 to vector<4x32xf32>
    %80 = arith.mulf %79, %9 : vector<4x32xf32>
    %81 = arith.addf %78, %80 : vector<4x32xf32>
    %c0_36 = arith.constant 0 : index
    %c320 = arith.constant 320 : index
    %82 = vector.load %arg9[%c0_36, %c320] : memref<4x1024xf32, #tpu.memory_space<vmem>>, vector<4x32xf32>
    tpu.vector_store %arg9[%c0_36, %c320], %81 {strides = array<i32>} : memref<4x1024xf32, #tpu.memory_space<vmem>>, vector<4x32xf32>,
    %cst_37 = arith.constant 7.500000e-01 : f32
    %83 = vector.broadcast %cst_37 : f32 to vector<4x32xf32>
    %84 = arith.mulf %83, %9 : vector<4x32xf32>
    %cst_38 = arith.constant 2.500000e-01 : f32
    %85 = vector.broadcast %cst_38 : f32 to vector<4x32xf32>
    %86 = arith.mulf %85, %10 : vector<4x32xf32>
    %87 = arith.addf %84, %86 : vector<4x32xf32>
    %c0_39 = arith.constant 0 : index
    %c352 = arith.constant 352 : index
    %88 = vector.load %arg9[%c0_39, %c352] : memref<4x1024xf32, #tpu.memory_space<vmem>>, vector<4x32xf32>
    tpu.vector_store %arg9[%c0_39, %c352], %87 {strides = array<i32>} : memref<4x1024xf32, #tpu.memory_space<vmem>>, vector<4x32xf32>,
    %cst_40 = arith.constant 2.500000e-01 : f32
    %89 = vector.broadcast %cst_40 : f32 to vector<4x32xf32>
    %90 = arith.mulf %89, %9 : vector<4x32xf32>
    %cst_41 = arith.constant 7.500000e-01 : f32
    %91 = vector.broadcast %cst_41 : f32 to vector<4x32xf32>
    %92 = arith.mulf %91, %10 : vector<4x32xf32>
    %93 = arith.addf %90, %92 : vector<4x32xf32>
    %c0_42 = arith.constant 0 : index
    %c384 = arith.constant 384 : index
    %94 = vector.load %arg9[%c0_42, %c384] : memref<4x1024xf32, #tpu.memory_space<vmem>>, vector<4x32xf32>
    tpu.vector_store %arg9[%c0_42, %c384], %93 {strides = array<i32>} : memref<4x1024xf32, #tpu.memory_space<vmem>>, vector<4x32xf32>,
    %cst_43 = arith.constant 7.500000e-01 : f32
    %95 = vector.broadcast %cst_43 : f32 to vector<4x32xf32>
    %96 = arith.mulf %95, %10 : vector<4x32xf32>
    %cst_44 = arith.constant 2.500000e-01 : f32
    %97 = vector.broadcast %cst_44 : f32 to vector<4x32xf32>
    %98 = arith.mulf %97, %11 : vector<4x32xf32>
    %99 = arith.addf %96, %98 : vector<4x32xf32>
    %c0_45 = arith.constant 0 : index
    %c416 = arith.constant 416 : index
    %100 = vector.load %arg9[%c0_45, %c416] : memref<4x1024xf32, #tpu.memory_space<vmem>>, vector<4x32xf32>
    tpu.vector_store %arg9[%c0_45, %c416], %99 {strides = array<i32>} : memref<4x1024xf32, #tpu.memory_space<vmem>>, vector<4x32xf32>,
    %cst_46 = arith.constant 2.500000e-01 : f32
    %101 = vector.broadcast %cst_46 : f32 to vector<4x32xf32>
    %102 = arith.mulf %101, %10 : vector<4x32xf32>
    %cst_47 = arith.constant 7.500000e-01 : f32
    %103 = vector.broadcast %cst_47 : f32 to vector<4x32xf32>
    %104 = arith.mulf %103, %11 : vector<4x32xf32>
    %105 = arith.addf %102, %104 : vector<4x32xf32>
    %c0_48 = arith.constant 0 : index
    %c448 = arith.constant 448 : index
    %106 = vector.load %arg9[%c0_48, %c448] : memref<4x1024xf32, #tpu.memory_space<vmem>>, vector<4x32xf32>
    tpu.vector_store %arg9[%c0_48, %c448], %105 {strides = array<i32>} : memref<4x1024xf32, #tpu.memory_space<vmem>>, vector<4x32xf32>,
    %cst_49 = arith.constant 7.500000e-01 : f32
    %107 = vector.broadcast %cst_49 : f32 to vector<4x32xf32>
    %108 = arith.mulf %107, %11 : vector<4x32xf32>
    %cst_50 = arith.constant 2.500000e-01 : f32
    %109 = vector.broadcast %cst_50 : f32 to vector<4x32xf32>
    %110 = arith.mulf %109, %12 : vector<4x32xf32>
    %111 = arith.addf %108, %110 : vector<4x32xf32>
    %c0_51 = arith.constant 0 : index
    %c480 = arith.constant 480 : index
    %112 = vector.load %arg9[%c0_51, %c480] : memref<4x1024xf32, #tpu.memory_space<vmem>>, vector<4x32xf32>
    tpu.vector_store %arg9[%c0_51, %c480], %111 {strides = array<i32>} : memref<4x1024xf32, #tpu.memory_space<vmem>>, vector<4x32xf32>,
    %cst_52 = arith.constant 2.500000e-01 : f32
    %113 = vector.broadcast %cst_52 : f32 to vector<4x32xf32>
    %114 = arith.mulf %113, %11 : vector<4x32xf32>
    %cst_53 = arith.constant 7.500000e-01 : f32
    %115 = vector.broadcast %cst_53 : f32 to vector<4x32xf32>
    %116 = arith.mulf %115, %12 : vector<4x32xf32>
    %117 = arith.addf %114, %116 : vector<4x32xf32>
    %c0_54 = arith.constant 0 : index
    %c512 = arith.constant 512 : index
    %118 = vector.load %arg9[%c0_54, %c512] : memref<4x1024xf32, #tpu.memory_space<vmem>>, vector<4x32xf32>
    tpu.vector_store %arg9[%c0_54, %c512], %117 {strides = array<i32>} : memref<4x1024xf32, #tpu.memory_space<vmem>>, vector<4x32xf32>,
    %cst_55 = arith.constant 7.500000e-01 : f32
    %119 = vector.broadcast %cst_55 : f32 to vector<4x32xf32>
    %120 = arith.mulf %119, %12 : vector<4x32xf32>
    %cst_56 = arith.constant 2.500000e-01 : f32
    %121 = vector.broadcast %cst_56 : f32 to vector<4x32xf32>
    %122 = arith.mulf %121, %13 : vector<4x32xf32>
    %123 = arith.addf %120, %122 : vector<4x32xf32>
    %c0_57 = arith.constant 0 : index
    %c544 = arith.constant 544 : index
    %124 = vector.load %arg9[%c0_57, %c544] : memref<4x1024xf32, #tpu.memory_space<vmem>>, vector<4x32xf32>
    tpu.vector_store %arg9[%c0_57, %c544], %123 {strides = array<i32>} : memref<4x1024xf32, #tpu.memory_space<vmem>>, vector<4x32xf32>,
    %cst_58 = arith.constant 2.500000e-01 : f32
    %125 = vector.broadcast %cst_58 : f32 to vector<4x32xf32>
    %126 = arith.mulf %125, %12 : vector<4x32xf32>
    %cst_59 = arith.constant 7.500000e-01 : f32
    %127 = vector.broadcast %cst_59 : f32 to vector<4x32xf32>
    %128 = arith.mulf %127, %13 : vector<4x32xf32>
    %129 = arith.addf %126, %128 : vector<4x32xf32>
    %c0_60 = arith.constant 0 : index
    %c576 = arith.constant 576 : index
    %130 = vector.load %arg9[%c0_60, %c576] : memref<4x1024xf32, #tpu.memory_space<vmem>>, vector<4x32xf32>
    tpu.vector_store %arg9[%c0_60, %c576], %129 {strides = array<i32>} : memref<4x1024xf32, #tpu.memory_space<vmem>>, vector<4x32xf32>,
    %cst_61 = arith.constant 7.500000e-01 : f32
    %131 = vector.broadcast %cst_61 : f32 to vector<4x32xf32>
    %132 = arith.mulf %131, %13 : vector<4x32xf32>
    %cst_62 = arith.constant 2.500000e-01 : f32
    %133 = vector.broadcast %cst_62 : f32 to vector<4x32xf32>
    %134 = arith.mulf %133, %14 : vector<4x32xf32>
    %135 = arith.addf %132, %134 : vector<4x32xf32>
    %c0_63 = arith.constant 0 : index
    %c608 = arith.constant 608 : index
    %136 = vector.load %arg9[%c0_63, %c608] : memref<4x1024xf32, #tpu.memory_space<vmem>>, vector<4x32xf32>
    tpu.vector_store %arg9[%c0_63, %c608], %135 {strides = array<i32>} : memref<4x1024xf32, #tpu.memory_space<vmem>>, vector<4x32xf32>,
    %cst_64 = arith.constant 2.500000e-01 : f32
    %137 = vector.broadcast %cst_64 : f32 to vector<4x32xf32>
    %138 = arith.mulf %137, %13 : vector<4x32xf32>
    %cst_65 = arith.constant 7.500000e-01 : f32
    %139 = vector.broadcast %cst_65 : f32 to vector<4x32xf32>
    %140 = arith.mulf %139, %14 : vector<4x32xf32>
    %141 = arith.addf %138, %140 : vector<4x32xf32>
    %c0_66 = arith.constant 0 : index
    %c640 = arith.constant 640 : index
    %142 = vector.load %arg9[%c0_66, %c640] : memref<4x1024xf32, #tpu.memory_space<vmem>>, vector<4x32xf32>
    tpu.vector_store %arg9[%c0_66, %c640], %141 {strides = array<i32>} : memref<4x1024xf32, #tpu.memory_space<vmem>>, vector<4x32xf32>,
    %cst_67 = arith.constant 7.500000e-01 : f32
    %143 = vector.broadcast %cst_67 : f32 to vector<4x32xf32>
    %144 = arith.mulf %143, %14 : vector<4x32xf32>
    %cst_68 = arith.constant 2.500000e-01 : f32
    %145 = vector.broadcast %cst_68 : f32 to vector<4x32xf32>
    %146 = arith.mulf %145, %15 : vector<4x32xf32>
    %147 = arith.addf %144, %146 : vector<4x32xf32>
    %c0_69 = arith.constant 0 : index
    %c672 = arith.constant 672 : index
    %148 = vector.load %arg9[%c0_69, %c672] : memref<4x1024xf32, #tpu.memory_space<vmem>>, vector<4x32xf32>
    tpu.vector_store %arg9[%c0_69, %c672], %147 {strides = array<i32>} : memref<4x1024xf32, #tpu.memory_space<vmem>>, vector<4x32xf32>,
    %cst_70 = arith.constant 2.500000e-01 : f32
    %149 = vector.broadcast %cst_70 : f32 to vector<4x32xf32>
    %150 = arith.mulf %149, %14 : vector<4x32xf32>
    %cst_71 = arith.constant 7.500000e-01 : f32
    %151 = vector.broadcast %cst_71 : f32 to vector<4x32xf32>
    %152 = arith.mulf %151, %15 : vector<4x32xf32>
    %153 = arith.addf %150, %152 : vector<4x32xf32>
    %c0_72 = arith.constant 0 : index
    %c704 = arith.constant 704 : index
    %154 = vector.load %arg9[%c0_72, %c704] : memref<4x1024xf32, #tpu.memory_space<vmem>>, vector<4x32xf32>
    tpu.vector_store %arg9[%c0_72, %c704], %153 {strides = array<i32>} : memref<4x1024xf32, #tpu.memory_space<vmem>>, vector<4x32xf32>,
    %cst_73 = arith.constant 7.500000e-01 : f32
    %155 = vector.broadcast %cst_73 : f32 to vector<4x32xf32>
    %156 = arith.mulf %155, %15 : vector<4x32xf32>
    %cst_74 = arith.constant 2.500000e-01 : f32
    %157 = vector.broadcast %cst_74 : f32 to vector<4x32xf32>
    %158 = arith.mulf %157, %16 : vector<4x32xf32>
    %159 = arith.addf %156, %158 : vector<4x32xf32>
    %c0_75 = arith.constant 0 : index
    %c736 = arith.constant 736 : index
    %160 = vector.load %arg9[%c0_75, %c736] : memref<4x1024xf32, #tpu.memory_space<vmem>>, vector<4x32xf32>
    tpu.vector_store %arg9[%c0_75, %c736], %159 {strides = array<i32>} : memref<4x1024xf32, #tpu.memory_space<vmem>>, vector<4x32xf32>,
    %cst_76 = arith.constant 2.500000e-01 : f32
    %161 = vector.broadcast %cst_76 : f32 to vector<4x32xf32>
    %162 = arith.mulf %161, %15 : vector<4x32xf32>
    %cst_77 = arith.constant 7.500000e-01 : f32
    %163 = vector.broadcast %cst_77 : f32 to vector<4x32xf32>
    %164 = arith.mulf %163, %16 : vector<4x32xf32>
    %165 = arith.addf %162, %164 : vector<4x32xf32>
    %c0_78 = arith.constant 0 : index
    %c768 = arith.constant 768 : index
    %166 = vector.load %arg9[%c0_78, %c768] : memref<4x1024xf32, #tpu.memory_space<vmem>>, vector<4x32xf32>
    tpu.vector_store %arg9[%c0_78, %c768], %165 {strides = array<i32>} : memref<4x1024xf32, #tpu.memory_space<vmem>>, vector<4x32xf32>,
    %cst_79 = arith.constant 7.500000e-01 : f32
    %167 = vector.broadcast %cst_79 : f32 to vector<4x32xf32>
    %168 = arith.mulf %167, %16 : vector<4x32xf32>
    %cst_80 = arith.constant 2.500000e-01 : f32
    %169 = vector.broadcast %cst_80 : f32 to vector<4x32xf32>
    %170 = arith.mulf %169, %17 : vector<4x32xf32>
    %171 = arith.addf %168, %170 : vector<4x32xf32>
    %c0_81 = arith.constant 0 : index
    %c800 = arith.constant 800 : index
    %172 = vector.load %arg9[%c0_81, %c800] : memref<4x1024xf32, #tpu.memory_space<vmem>>, vector<4x32xf32>
    tpu.vector_store %arg9[%c0_81, %c800], %171 {strides = array<i32>} : memref<4x1024xf32, #tpu.memory_space<vmem>>, vector<4x32xf32>,
    %cst_82 = arith.constant 2.500000e-01 : f32
    %173 = vector.broadcast %cst_82 : f32 to vector<4x32xf32>
    %174 = arith.mulf %173, %16 : vector<4x32xf32>
    %cst_83 = arith.constant 7.500000e-01 : f32
    %175 = vector.broadcast %cst_83 : f32 to vector<4x32xf32>
    %176 = arith.mulf %175, %17 : vector<4x32xf32>
    %177 = arith.addf %174, %176 : vector<4x32xf32>
    %c0_84 = arith.constant 0 : index
    %c832 = arith.constant 832 : index
    %178 = vector.load %arg9[%c0_84, %c832] : memref<4x1024xf32, #tpu.memory_space<vmem>>, vector<4x32xf32>
    tpu.vector_store %arg9[%c0_84, %c832], %177 {strides = array<i32>} : memref<4x1024xf32, #tpu.memory_space<vmem>>, vector<4x32xf32>,
    %cst_85 = arith.constant 7.500000e-01 : f32
    %179 = vector.broadcast %cst_85 : f32 to vector<4x32xf32>
    %180 = arith.mulf %179, %17 : vector<4x32xf32>
    %cst_86 = arith.constant 2.500000e-01 : f32
    %181 = vector.broadcast %cst_86 : f32 to vector<4x32xf32>
    %182 = arith.mulf %181, %18 : vector<4x32xf32>
    %183 = arith.addf %180, %182 : vector<4x32xf32>
    %c0_87 = arith.constant 0 : index
    %c864 = arith.constant 864 : index
    %184 = vector.load %arg9[%c0_87, %c864] : memref<4x1024xf32, #tpu.memory_space<vmem>>, vector<4x32xf32>
    tpu.vector_store %arg9[%c0_87, %c864], %183 {strides = array<i32>} : memref<4x1024xf32, #tpu.memory_space<vmem>>, vector<4x32xf32>,
    %cst_88 = arith.constant 2.500000e-01 : f32
    %185 = vector.broadcast %cst_88 : f32 to vector<4x32xf32>
    %186 = arith.mulf %185, %17 : vector<4x32xf32>
    %cst_89 = arith.constant 7.500000e-01 : f32
    %187 = vector.broadcast %cst_89 : f32 to vector<4x32xf32>
    %188 = arith.mulf %187, %18 : vector<4x32xf32>
    %189 = arith.addf %186, %188 : vector<4x32xf32>
    %c0_90 = arith.constant 0 : index
    %c896 = arith.constant 896 : index
    %190 = vector.load %arg9[%c0_90, %c896] : memref<4x1024xf32, #tpu.memory_space<vmem>>, vector<4x32xf32>
    tpu.vector_store %arg9[%c0_90, %c896], %189 {strides = array<i32>} : memref<4x1024xf32, #tpu.memory_space<vmem>>, vector<4x32xf32>,
    %cst_91 = arith.constant 7.500000e-01 : f32
    %191 = vector.broadcast %cst_91 : f32 to vector<4x32xf32>
    %192 = arith.mulf %191, %18 : vector<4x32xf32>
    %cst_92 = arith.constant 2.500000e-01 : f32
    %193 = vector.broadcast %cst_92 : f32 to vector<4x32xf32>
    %194 = arith.mulf %193, %19 : vector<4x32xf32>
    %195 = arith.addf %192, %194 : vector<4x32xf32>
    %c0_93 = arith.constant 0 : index
    %c928 = arith.constant 928 : index
    %196 = vector.load %arg9[%c0_93, %c928] : memref<4x1024xf32, #tpu.memory_space<vmem>>, vector<4x32xf32>
    tpu.vector_store %arg9[%c0_93, %c928], %195 {strides = array<i32>} : memref<4x1024xf32, #tpu.memory_space<vmem>>, vector<4x32xf32>,
    %cst_94 = arith.constant 2.500000e-01 : f32
    %197 = vector.broadcast %cst_94 : f32 to vector<4x32xf32>
    %198 = arith.mulf %197, %18 : vector<4x32xf32>
    %cst_95 = arith.constant 7.500000e-01 : f32
    %199 = vector.broadcast %cst_95 : f32 to vector<4x32xf32>
    %200 = arith.mulf %199, %19 : vector<4x32xf32>
    %201 = arith.addf %198, %200 : vector<4x32xf32>
    %c0_96 = arith.constant 0 : index
    %c960 = arith.constant 960 : index
    %202 = vector.load %arg9[%c0_96, %c960] : memref<4x1024xf32, #tpu.memory_space<vmem>>, vector<4x32xf32>
    tpu.vector_store %arg9[%c0_96, %c960], %201 {strides = array<i32>} : memref<4x1024xf32, #tpu.memory_space<vmem>>, vector<4x32xf32>,
    %cst_97 = arith.constant 1.000000e+00 : f32
    %203 = vector.broadcast %cst_97 : f32 to vector<4x32xf32>
    %204 = arith.mulf %203, %19 : vector<4x32xf32>
    %c0_98 = arith.constant 0 : index
    %c992 = arith.constant 992 : index
    %205 = vector.load %arg9[%c0_98, %c992] : memref<4x1024xf32, #tpu.memory_space<vmem>>, vector<4x32xf32>
    tpu.vector_store %arg9[%c0_98, %c992], %204 {strides = array<i32>} : memref<4x1024xf32, #tpu.memory_space<vmem>>, vector<4x32xf32>,
    %c0_99 = arith.constant 0 : index
    %c0_100 = arith.constant 0 : index
    %206 = vector.load %arg3[%c0_99, %c0_100] : memref<9x1024xf32, #tpu.memory_space<vmem>>, vector<9x1024xf32>
    %c0_101 = arith.constant 0 : index
    %c0_102 = arith.constant 0 : index
    %207 = vector.load %arg9[%c0_101, %c0_102] : memref<4x1024xf32, #tpu.memory_space<vmem>>, vector<4x1024xf32>
    %208 = vector.extract_strided_slice %207 {offsets = [0, 991], sizes = [4, 33], strides = [1, 1]} : vector<4x1024xf32> to vector<4x33xf32>
    %209 = vector.extract_strided_slice %207 {offsets = [0, 0], sizes = [4, 991], strides = [1, 1]} : vector<4x1024xf32> to vector<4x991xf32>
    %210 = tpu.concatenate %208, %209 in 1 : vector<4x33xf32>, vector<4x991xf32> -> vector<4x1024xf32>
    %211 = vector.extract_strided_slice %206 {offsets = [0, 0], sizes = [1, 1024], strides = [1, 1]} : vector<9x1024xf32> to vector<1x1024xf32>
    %212 = vector.broadcast %211 : vector<1x1024xf32> to vector<4x1024xf32>
    %213 = arith.mulf %210, %212 : vector<4x1024xf32>
    %c0_103 = arith.constant 0 : index
    %c0_104 = arith.constant 0 : index
    %214 = vector.load %arg10[%c0_103, %c0_104] : memref<36x1024xf32, #tpu.memory_space<vmem>>, vector<4x1024xf32>
    tpu.vector_store %arg10[%c0_103, %c0_104], %213 {strides = array<i32>} : memref<36x1024xf32, #tpu.memory_space<vmem>>, vector<4x1024xf32>,
    %215 = vector.extract_strided_slice %207 {offsets = [0, 992], sizes = [4, 32], strides = [1, 1]} : vector<4x1024xf32> to vector<4x32xf32>
    %216 = vector.extract_strided_slice %207 {offsets = [0, 0], sizes = [4, 992], strides = [1, 1]} : vector<4x1024xf32> to vector<4x992xf32>
    %217 = tpu.concatenate %215, %216 in 1 : vector<4x32xf32>, vector<4x992xf32> -> vector<4x1024xf32>
    %218 = vector.extract_strided_slice %206 {offsets = [1, 0], sizes = [1, 1024], strides = [1, 1]} : vector<9x1024xf32> to vector<1x1024xf32>
    %219 = vector.broadcast %218 : vector<1x1024xf32> to vector<4x1024xf32>
    %220 = arith.mulf %217, %219 : vector<4x1024xf32>
    %c4 = arith.constant 4 : index
    %c0_105 = arith.constant 0 : index
    %221 = vector.load %arg10[%c4, %c0_105] : memref<36x1024xf32, #tpu.memory_space<vmem>>, vector<4x1024xf32>
    tpu.vector_store %arg10[%c4, %c0_105], %220 {strides = array<i32>} : memref<36x1024xf32, #tpu.memory_space<vmem>>, vector<4x1024xf32>,
    %222 = vector.extract_strided_slice %207 {offsets = [0, 993], sizes = [4, 31], strides = [1, 1]} : vector<4x1024xf32> to vector<4x31xf32>
    %223 = vector.extract_strided_slice %207 {offsets = [0, 0], sizes = [4, 993], strides = [1, 1]} : vector<4x1024xf32> to vector<4x993xf32>
    %224 = tpu.concatenate %222, %223 in 1 : vector<4x31xf32>, vector<4x993xf32> -> vector<4x1024xf32>
    %225 = vector.extract_strided_slice %206 {offsets = [2, 0], sizes = [1, 1024], strides = [1, 1]} : vector<9x1024xf32> to vector<1x1024xf32>
    %226 = vector.broadcast %225 : vector<1x1024xf32> to vector<4x1024xf32>
    %227 = arith.mulf %224, %226 : vector<4x1024xf32>
    %c8 = arith.constant 8 : index
    %c0_106 = arith.constant 0 : index
    %228 = vector.load %arg10[%c8, %c0_106] : memref<36x1024xf32, #tpu.memory_space<vmem>>, vector<4x1024xf32>
    tpu.vector_store %arg10[%c8, %c0_106], %227 {strides = array<i32>} : memref<36x1024xf32, #tpu.memory_space<vmem>>, vector<4x1024xf32>,
    %229 = vector.extract_strided_slice %207 {offsets = [0, 1023], sizes = [4, 1], strides = [1, 1]} : vector<4x1024xf32> to vector<4x1xf32>
    %230 = vector.extract_strided_slice %207 {offsets = [0, 0], sizes = [4, 1023], strides = [1, 1]} : vector<4x1024xf32> to vector<4x1023xf32>
    %231 = tpu.concatenate %229, %230 in 1 : vector<4x1xf32>, vector<4x1023xf32> -> vector<4x1024xf32>
    %232 = vector.extract_strided_slice %206 {offsets = [3, 0], sizes = [1, 1024], strides = [1, 1]} : vector<9x1024xf32> to vector<1x1024xf32>
    %233 = vector.broadcast %232 : vector<1x1024xf32> to vector<4x1024xf32>
    %234 = arith.mulf %231, %233 : vector<4x1024xf32>
    %c12 = arith.constant 12 : index
    %c0_107 = arith.constant 0 : index
    %235 = vector.load %arg10[%c12, %c0_107] : memref<36x1024xf32, #tpu.memory_space<vmem>>, vector<4x1024xf32>
    tpu.vector_store %arg10[%c12, %c0_107], %234 {strides = array<i32>} : memref<36x1024xf32, #tpu.memory_space<vmem>>, vector<4x1024xf32>,
    %c16 = arith.constant 16 : index
    %c0_108 = arith.constant 0 : index
    %236 = vector.load %arg10[%c16, %c0_108] : memref<36x1024xf32, #tpu.memory_space<vmem>>, vector<4x1024xf32>
    tpu.vector_store %arg10[%c16, %c0_108], %207 {strides = array<i32>} : memref<36x1024xf32, #tpu.memory_space<vmem>>, vector<4x1024xf32>,
    %237 = vector.extract_strided_slice %207 {offsets = [0, 1], sizes = [4, 1023], strides = [1, 1]} : vector<4x1024xf32> to vector<4x1023xf32>
    %238 = vector.extract_strided_slice %207 {offsets = [0, 0], sizes = [4, 1], strides = [1, 1]} : vector<4x1024xf32> to vector<4x1xf32>
    %239 = tpu.concatenate %237, %238 in 1 : vector<4x1023xf32>, vector<4x1xf32> -> vector<4x1024xf32>
    %240 = vector.extract_strided_slice %206 {offsets = [5, 0], sizes = [1, 1024], strides = [1, 1]} : vector<9x1024xf32> to vector<1x1024xf32>
    %241 = vector.broadcast %240 : vector<1x1024xf32> to vector<4x1024xf32>
    %242 = arith.mulf %239, %241 : vector<4x1024xf32>
    %c20 = arith.constant 20 : index
    %c0_109 = arith.constant 0 : index
    %243 = vector.load %arg10[%c20, %c0_109] : memref<36x1024xf32, #tpu.memory_space<vmem>>, vector<4x1024xf32>
    tpu.vector_store %arg10[%c20, %c0_109], %242 {strides = array<i32>} : memref<36x1024xf32, #tpu.memory_space<vmem>>, vector<4x1024xf32>,
    %244 = vector.extract_strided_slice %207 {offsets = [0, 31], sizes = [4, 993], strides = [1, 1]} : vector<4x1024xf32> to vector<4x993xf32>
    %245 = vector.extract_strided_slice %207 {offsets = [0, 0], sizes = [4, 31], strides = [1, 1]} : vector<4x1024xf32> to vector<4x31xf32>
    %246 = tpu.concatenate %244, %245 in 1 : vector<4x993xf32>, vector<4x31xf32> -> vector<4x1024xf32>
    %247 = vector.extract_strided_slice %206 {offsets = [6, 0], sizes = [1, 1024], strides = [1, 1]} : vector<9x1024xf32> to vector<1x1024xf32>
    %248 = vector.broadcast %247 : vector<1x1024xf32> to vector<4x1024xf32>
    %249 = arith.mulf %246, %248 : vector<4x1024xf32>
    %c24 = arith.constant 24 : index
    %c0_110 = arith.constant 0 : index
    %250 = vector.load %arg10[%c24, %c0_110] : memref<36x1024xf32, #tpu.memory_space<vmem>>, vector<4x1024xf32>
    tpu.vector_store %arg10[%c24, %c0_110], %249 {strides = array<i32>} : memref<36x1024xf32, #tpu.memory_space<vmem>>, vector<4x1024xf32>,
    %251 = vector.extract_strided_slice %207 {offsets = [0, 32], sizes = [4, 992], strides = [1, 1]} : vector<4x1024xf32> to vector<4x992xf32>
    %252 = vector.extract_strided_slice %207 {offsets = [0, 0], sizes = [4, 32], strides = [1, 1]} : vector<4x1024xf32> to vector<4x32xf32>
    %253 = tpu.concatenate %251, %252 in 1 : vector<4x992xf32>, vector<4x32xf32> -> vector<4x1024xf32>
    %254 = vector.extract_strided_slice %206 {offsets = [7, 0], sizes = [1, 1024], strides = [1, 1]} : vector<9x1024xf32> to vector<1x1024xf32>
    %255 = vector.broadcast %254 : vector<1x1024xf32> to vector<4x1024xf32>
    %256 = arith.mulf %253, %255 : vector<4x1024xf32>
    %c28 = arith.constant 28 : index
    %c0_111 = arith.constant 0 : index
    %257 = vector.load %arg10[%c28, %c0_111] : memref<36x1024xf32, #tpu.memory_space<vmem>>, vector<4x1024xf32>
    tpu.vector_store %arg10[%c28, %c0_111], %256 {strides = array<i32>} : memref<36x1024xf32, #tpu.memory_space<vmem>>, vector<4x1024xf32>,
    %258 = vector.extract_strided_slice %207 {offsets = [0, 33], sizes = [4, 991], strides = [1, 1]} : vector<4x1024xf32> to vector<4x991xf32>
    %259 = vector.extract_strided_slice %207 {offsets = [0, 0], sizes = [4, 33], strides = [1, 1]} : vector<4x1024xf32> to vector<4x33xf32>
    %260 = tpu.concatenate %258, %259 in 1 : vector<4x991xf32>, vector<4x33xf32> -> vector<4x1024xf32>
    %261 = vector.extract_strided_slice %206 {offsets = [8, 0], sizes = [1, 1024], strides = [1, 1]} : vector<9x1024xf32> to vector<1x1024xf32>
    %262 = vector.broadcast %261 : vector<1x1024xf32> to vector<4x1024xf32>
    %263 = arith.mulf %260, %262 : vector<4x1024xf32>
    %c32_112 = arith.constant 32 : index
    %c0_113 = arith.constant 0 : index
    %264 = vector.load %arg10[%c32_112, %c0_113] : memref<36x1024xf32, #tpu.memory_space<vmem>>, vector<4x1024xf32>
    tpu.vector_store %arg10[%c32_112, %c0_113], %263 {strides = array<i32>} : memref<36x1024xf32, #tpu.memory_space<vmem>>, vector<4x1024xf32>,
    %c0_114 = arith.constant 0 : index
    %c0_115 = arith.constant 0 : index
    %265 = vector.load %arg10[%c0_114, %c0_115] : memref<36x1024xf32, #tpu.memory_space<vmem>>, vector<36x1024xf32>
    %c0_116 = arith.constant 0 : index
    %c0_117 = arith.constant 0 : index
    %266 = vector.load %arg4[%c0_116, %c0_117] : memref<8x36xf32, #tpu.memory_space<vmem>>, vector<8x36xf32>
    %cst_118 = arith.constant dense<0.000000e+00> : vector<8x1024xf32>
    %267 = tpu.matmul %266, %265, %cst_118 {dimension_numbers = #tpu.dot_dimension_numbers<[1], [0], [0], [1], [0, 0, 1, 1], [], []>} : vector<8x36xf32>, vector<36x1024xf32>, vector<8x1024xf32> -> vector<8x1024xf32>
    %c0_119 = arith.constant 0 : index
    %c0_120 = arith.constant 0 : index
    %268 = vector.load %arg6[%c0_119, %c0_120] : memref<8x1xf32, #tpu.memory_space<vmem>>, vector<8x1xf32>
    %269 = vector.broadcast %268 : vector<8x1xf32> to vector<8x1024xf32>
    %270 = arith.addf %267, %269 : vector<8x1024xf32>
    %cst_121 = arith.constant 0.000000e+00 : f32
    %271 = vector.broadcast %cst_121 : f32 to vector<8x1024xf32>
    %272 = arith.maximumf %270, %271 : vector<8x1024xf32>
    %273 = vector.extract_strided_slice %272 {offsets = [0, 991], sizes = [8, 33], strides = [1, 1]} : vector<8x1024xf32> to vector<8x33xf32>
    %274 = vector.extract_strided_slice %272 {offsets = [0, 0], sizes = [8, 991], strides = [1, 1]} : vector<8x1024xf32> to vector<8x991xf32>
    %275 = tpu.concatenate %273, %274 in 1 : vector<8x33xf32>, vector<8x991xf32> -> vector<8x1024xf32>
    %276 = vector.extract_strided_slice %206 {offsets = [0, 0], sizes = [1, 1024], strides = [1, 1]} : vector<9x1024xf32> to vector<1x1024xf32>
    %277 = vector.broadcast %276 : vector<1x1024xf32> to vector<8x1024xf32>
    %278 = arith.mulf %275, %277 : vector<8x1024xf32>
    %c0_122 = arith.constant 0 : index
    %c0_123 = arith.constant 0 : index
    %279 = vector.load %arg11[%c0_122, %c0_123] : memref<72x1024xf32, #tpu.memory_space<vmem>>, vector<8x1024xf32>
    tpu.vector_store %arg11[%c0_122, %c0_123], %278 {strides = array<i32>} : memref<72x1024xf32, #tpu.memory_space<vmem>>, vector<8x1024xf32>,
    %280 = vector.extract_strided_slice %272 {offsets = [0, 992], sizes = [8, 32], strides = [1, 1]} : vector<8x1024xf32> to vector<8x32xf32>
    %281 = vector.extract_strided_slice %272 {offsets = [0, 0], sizes = [8, 992], strides = [1, 1]} : vector<8x1024xf32> to vector<8x992xf32>
    %282 = tpu.concatenate %280, %281 in 1 : vector<8x32xf32>, vector<8x992xf32> -> vector<8x1024xf32>
    %283 = vector.extract_strided_slice %206 {offsets = [1, 0], sizes = [1, 1024], strides = [1, 1]} : vector<9x1024xf32> to vector<1x1024xf32>
    %284 = vector.broadcast %283 : vector<1x1024xf32> to vector<8x1024xf32>
    %285 = arith.mulf %282, %284 : vector<8x1024xf32>
    %c8_124 = arith.constant 8 : index
    %c0_125 = arith.constant 0 : index
    %286 = vector.load %arg11[%c8_124, %c0_125] : memref<72x1024xf32, #tpu.memory_space<vmem>>, vector<8x1024xf32>
    tpu.vector_store %arg11[%c8_124, %c0_125], %285 {strides = array<i32>} : memref<72x1024xf32, #tpu.memory_space<vmem>>, vector<8x1024xf32>,
    %287 = vector.extract_strided_slice %272 {offsets = [0, 993], sizes = [8, 31], strides = [1, 1]} : vector<8x1024xf32> to vector<8x31xf32>
    %288 = vector.extract_strided_slice %272 {offsets = [0, 0], sizes = [8, 993], strides = [1, 1]} : vector<8x1024xf32> to vector<8x993xf32>
    %289 = tpu.concatenate %287, %288 in 1 : vector<8x31xf32>, vector<8x993xf32> -> vector<8x1024xf32>
    %290 = vector.extract_strided_slice %206 {offsets = [2, 0], sizes = [1, 1024], strides = [1, 1]} : vector<9x1024xf32> to vector<1x1024xf32>
    %291 = vector.broadcast %290 : vector<1x1024xf32> to vector<8x1024xf32>
    %292 = arith.mulf %289, %291 : vector<8x1024xf32>
    %c16_126 = arith.constant 16 : index
    %c0_127 = arith.constant 0 : index
    %293 = vector.load %arg11[%c16_126, %c0_127] : memref<72x1024xf32, #tpu.memory_space<vmem>>, vector<8x1024xf32>
    tpu.vector_store %arg11[%c16_126, %c0_127], %292 {strides = array<i32>} : memref<72x1024xf32, #tpu.memory_space<vmem>>, vector<8x1024xf32>,
    %294 = vector.extract_strided_slice %272 {offsets = [0, 1023], sizes = [8, 1], strides = [1, 1]} : vector<8x1024xf32> to vector<8x1xf32>
    %295 = vector.extract_strided_slice %272 {offsets = [0, 0], sizes = [8, 1023], strides = [1, 1]} : vector<8x1024xf32> to vector<8x1023xf32>
    %296 = tpu.concatenate %294, %295 in 1 : vector<8x1xf32>, vector<8x1023xf32> -> vector<8x1024xf32>
    %297 = vector.extract_strided_slice %206 {offsets = [3, 0], sizes = [1, 1024], strides = [1, 1]} : vector<9x1024xf32> to vector<1x1024xf32>
    %298 = vector.broadcast %297 : vector<1x1024xf32> to vector<8x1024xf32>
    %299 = arith.mulf %296, %298 : vector<8x1024xf32>
    %c24_128 = arith.constant 24 : index
    %c0_129 = arith.constant 0 : index
    %300 = vector.load %arg11[%c24_128, %c0_129] : memref<72x1024xf32, #tpu.memory_space<vmem>>, vector<8x1024xf32>
    tpu.vector_store %arg11[%c24_128, %c0_129], %299 {strides = array<i32>} : memref<72x1024xf32, #tpu.memory_space<vmem>>, vector<8x1024xf32>,
    %c32_130 = arith.constant 32 : index
    %c0_131 = arith.constant 0 : index
    %301 = vector.load %arg11[%c32_130, %c0_131] : memref<72x1024xf32, #tpu.memory_space<vmem>>, vector<8x1024xf32>
    tpu.vector_store %arg11[%c32_130, %c0_131], %272 {strides = array<i32>} : memref<72x1024xf32, #tpu.memory_space<vmem>>, vector<8x1024xf32>,
    %302 = vector.extract_strided_slice %272 {offsets = [0, 1], sizes = [8, 1023], strides = [1, 1]} : vector<8x1024xf32> to vector<8x1023xf32>
    %303 = vector.extract_strided_slice %272 {offsets = [0, 0], sizes = [8, 1], strides = [1, 1]} : vector<8x1024xf32> to vector<8x1xf32>
    %304 = tpu.concatenate %302, %303 in 1 : vector<8x1023xf32>, vector<8x1xf32> -> vector<8x1024xf32>
    %305 = vector.extract_strided_slice %206 {offsets = [5, 0], sizes = [1, 1024], strides = [1, 1]} : vector<9x1024xf32> to vector<1x1024xf32>
    %306 = vector.broadcast %305 : vector<1x1024xf32> to vector<8x1024xf32>
    %307 = arith.mulf %304, %306 : vector<8x1024xf32>
    %c40 = arith.constant 40 : index
    %c0_132 = arith.constant 0 : index
    %308 = vector.load %arg11[%c40, %c0_132] : memref<72x1024xf32, #tpu.memory_space<vmem>>, vector<8x1024xf32>
    tpu.vector_store %arg11[%c40, %c0_132], %307 {strides = array<i32>} : memref<72x1024xf32, #tpu.memory_space<vmem>>, vector<8x1024xf32>,
    %309 = vector.extract_strided_slice %272 {offsets = [0, 31], sizes = [8, 993], strides = [1, 1]} : vector<8x1024xf32> to vector<8x993xf32>
    %310 = vector.extract_strided_slice %272 {offsets = [0, 0], sizes = [8, 31], strides = [1, 1]} : vector<8x1024xf32> to vector<8x31xf32>
    %311 = tpu.concatenate %309, %310 in 1 : vector<8x993xf32>, vector<8x31xf32> -> vector<8x1024xf32>
    %312 = vector.extract_strided_slice %206 {offsets = [6, 0], sizes = [1, 1024], strides = [1, 1]} : vector<9x1024xf32> to vector<1x1024xf32>
    %313 = vector.broadcast %312 : vector<1x1024xf32> to vector<8x1024xf32>
    %314 = arith.mulf %311, %313 : vector<8x1024xf32>
    %c48 = arith.constant 48 : index
    %c0_133 = arith.constant 0 : index
    %315 = vector.load %arg11[%c48, %c0_133] : memref<72x1024xf32, #tpu.memory_space<vmem>>, vector<8x1024xf32>
    tpu.vector_store %arg11[%c48, %c0_133], %314 {strides = array<i32>} : memref<72x1024xf32, #tpu.memory_space<vmem>>, vector<8x1024xf32>,
    %316 = vector.extract_strided_slice %272 {offsets = [0, 32], sizes = [8, 992], strides = [1, 1]} : vector<8x1024xf32> to vector<8x992xf32>
    %317 = vector.extract_strided_slice %272 {offsets = [0, 0], sizes = [8, 32], strides = [1, 1]} : vector<8x1024xf32> to vector<8x32xf32>
    %318 = tpu.concatenate %316, %317 in 1 : vector<8x992xf32>, vector<8x32xf32> -> vector<8x1024xf32>
    %319 = vector.extract_strided_slice %206 {offsets = [7, 0], sizes = [1, 1024], strides = [1, 1]} : vector<9x1024xf32> to vector<1x1024xf32>
    %320 = vector.broadcast %319 : vector<1x1024xf32> to vector<8x1024xf32>
    %321 = arith.mulf %318, %320 : vector<8x1024xf32>
    %c56 = arith.constant 56 : index
    %c0_134 = arith.constant 0 : index
    %322 = vector.load %arg11[%c56, %c0_134] : memref<72x1024xf32, #tpu.memory_space<vmem>>, vector<8x1024xf32>
    tpu.vector_store %arg11[%c56, %c0_134], %321 {strides = array<i32>} : memref<72x1024xf32, #tpu.memory_space<vmem>>, vector<8x1024xf32>,
    %323 = vector.extract_strided_slice %272 {offsets = [0, 33], sizes = [8, 991], strides = [1, 1]} : vector<8x1024xf32> to vector<8x991xf32>
    %324 = vector.extract_strided_slice %272 {offsets = [0, 0], sizes = [8, 33], strides = [1, 1]} : vector<8x1024xf32> to vector<8x33xf32>
    %325 = tpu.concatenate %323, %324 in 1 : vector<8x991xf32>, vector<8x33xf32> -> vector<8x1024xf32>
    %326 = vector.extract_strided_slice %206 {offsets = [8, 0], sizes = [1, 1024], strides = [1, 1]} : vector<9x1024xf32> to vector<1x1024xf32>
    %327 = vector.broadcast %326 : vector<1x1024xf32> to vector<8x1024xf32>
    %328 = arith.mulf %325, %327 : vector<8x1024xf32>
    %c64_135 = arith.constant 64 : index
    %c0_136 = arith.constant 0 : index
    %329 = vector.load %arg11[%c64_135, %c0_136] : memref<72x1024xf32, #tpu.memory_space<vmem>>, vector<8x1024xf32>
    tpu.vector_store %arg11[%c64_135, %c0_136], %328 {strides = array<i32>} : memref<72x1024xf32, #tpu.memory_space<vmem>>, vector<8x1024xf32>,
    %c0_137 = arith.constant 0 : index
    %c0_138 = arith.constant 0 : index
    %330 = vector.load %arg11[%c0_137, %c0_138] : memref<72x1024xf32, #tpu.memory_space<vmem>>, vector<72x1024xf32>
    %c0_139 = arith.constant 0 : index
    %c0_140 = arith.constant 0 : index
    %331 = vector.load %arg5[%c0_139, %c0_140] : memref<8x72xf32, #tpu.memory_space<vmem>>, vector<8x72xf32>
    %cst_141 = arith.constant dense<0.000000e+00> : vector<8x1024xf32>
    %332 = tpu.matmul %331, %330, %cst_141 {dimension_numbers = #tpu.dot_dimension_numbers<[1], [0], [0], [1], [0, 0, 1, 1], [], []>} : vector<8x72xf32>, vector<72x1024xf32>, vector<8x1024xf32> -> vector<8x1024xf32>
    %c0_142 = arith.constant 0 : index
    %c0_143 = arith.constant 0 : index
    %333 = vector.load %arg7[%c0_142, %c0_143] : memref<8x1xf32, #tpu.memory_space<vmem>>, vector<8x1xf32>
    %334 = vector.broadcast %333 : vector<8x1xf32> to vector<8x1024xf32>
    %335 = arith.addf %332, %334 : vector<8x1024xf32>
    %336 = math.tanh %335 : vector<8x1024xf32>
    %c0_144 = arith.constant 0 : index
    %c0_145 = arith.constant 0 : index
    %c0_146 = arith.constant 0 : index
    %337 = vector.load %arg8[%c0_144, %c0_145, %c0_146] : memref<1x8x1024xf32, #tpu.memory_space<vmem>>, vector<1x8x1024xf32>
    %338 = vector.shape_cast %337 : vector<1x8x1024xf32> to vector<8x1024xf32>
    %339 = vector.shape_cast %336 : vector<8x1024xf32> to vector<1x8x1024xf32>
    tpu.vector_store %arg8[%c0_144, %c0_145, %c0_146], %339 {strides = array<i32>} : memref<1x8x1024xf32, #tpu.memory_space<vmem>>, vector<1x8x1024xf32>,
    return
  }
  func.func @transform_0(%arg0: i32) -> (i32, i32, i32) {
    %c0_i32 = arith.constant 0 : i32
    %c0_i32_0 = arith.constant 0 : i32
    %c0_i32_1 = arith.constant 0 : i32
    return %arg0, %c0_i32, %c0_i32_0 : i32, i32, i32
  }
  func.func @transform_1(%arg0: i32) -> (i32, i32) {
    %c0_i32 = arith.constant 0 : i32
    %c0_i32_0 = arith.constant 0 : i32
    %c0_i32_1 = arith.constant 0 : i32
    return %c0_i32, %c0_i32_0 : i32, i32
  }
  func.func @transform_2(%arg0: i32) -> (i32, i32) {
    %c0_i32 = arith.constant 0 : i32
    %c0_i32_0 = arith.constant 0 : i32
    %c0_i32_1 = arith.constant 0 : i32
    return %c0_i32, %c0_i32_0 : i32, i32
  }
  func.func @transform_3(%arg0: i32) -> (i32, i32) {
    %c0_i32 = arith.constant 0 : i32
    %c0_i32_0 = arith.constant 0 : i32
    %c0_i32_1 = arith.constant 0 : i32
    return %c0_i32, %c0_i32_0 : i32, i32
  }
  func.func @transform_4(%arg0: i32) -> (i32, i32) {
    %c0_i32 = arith.constant 0 : i32
    %c0_i32_0 = arith.constant 0 : i32
    %c0_i32_1 = arith.constant 0 : i32
    return %c0_i32, %c0_i32_0 : i32, i32
  }
  func.func @transform_5(%arg0: i32) -> (i32, i32) {
    %c0_i32 = arith.constant 0 : i32
    %c0_i32_0 = arith.constant 0 : i32
    %c0_i32_1 = arith.constant 0 : i32
    return %c0_i32, %c0_i32_0 : i32, i32
  }
  func.func @transform_6(%arg0: i32) -> (i32, i32) {
    %c0_i32 = arith.constant 0 : i32
    %c0_i32_0 = arith.constant 0 : i32
    %c0_i32_1 = arith.constant 0 : i32
    return %c0_i32, %c0_i32_0 : i32, i32
  }
  func.func @transform_7(%arg0: i32) -> (i32, i32, i32) {
    %c0_i32 = arith.constant 0 : i32
    %c0_i32_0 = arith.constant 0 : i32
    %c0_i32_1 = arith.constant 0 : i32
    return %arg0, %c0_i32, %c0_i32_0 : i32, i32, i32
  }
}

</mosaic_0001>

<bundles_post_ra>
// kernel: upblock_forward.1
= control target key start
LH: loop header
LB: loop body
LE: loop exit
PB: predicated region body
PF: predicated region fallthrough
CT: control target
= control target key end

     0   :  { %s2952_s24 = smov 0   ;;  %s4229_s0 = inlined_call_operand.vmem [shape: f32[2,64,16], index: 0, kind: input, shape index: {}]   ;;  %s4230_s1 = inlined_call_operand.vmem [shape: f32[16,32], index: 1, kind: input, shape index: {}]   ;;  %s4231_s2 = inlined_call_operand.vmem [shape: f32[9,1024], index: 2, kind: input, shape index: {}]   ;;  %s4232_s3 = inlined_call_operand.vmem [shape: f32[8,36], index: 3, kind: input, shape index: {}]   ;;  %s4233_s4 = inlined_call_operand.vmem [shape: f32[8,72], index: 4, kind: input, shape index: {}]   ;;  %s4234_s5 = inlined_call_operand.vmem [shape: f32[8,1], index: 5, kind: input, shape index: {}]   ;;  %s4235_s6 = inlined_call_operand.vmem [shape: f32[8,1], index: 6, kind: input, shape index: {}]   ;;  %s4236_s7 = inlined_call_operand.vmem [shape: f32[2,8,1024], index: 7, kind: output, shape index: {}]  }
   0x1 LB: > { %s2680_s25 = sadd.s32 4294967295, %s2899_s24   ;;  %p2684_p0 = scmp.ge.s32.totalorder %s2899_s24, 1  ;;  %s2899_s24 = sphi %s2952_s24, %s17_s24  }
   0x2   : > { %p237_p1 = scmp.lt.s32.totalorder %s2899_s24, 3 }
   0x4   : > { %p238_p2 = pnand %p2684_p0, %p237_p1 }
   0x6   : > { %241 = sbr.rel (%p238_p2) target bundleno = 1310 (0x51e), region = 48 }
   0xd   : > { %v287_v0 = vld [vmem:[%s4230_s1] sm:$0xff]  ;;  %v288_v1 = vld [vmem:[%s4230_s1 + $0x8] sm:$0xff]  ;;  %p269_p3 = scmp.lt.s32.totalorder %s2680_s25, 1  ;;  %vm289_vm0 = vcmask 130048   ;;  %vm419_vm1 = vcmask 257024   ;;  %s2901_s11 = smov 96  }
   0xe   : > { %v2751_v2 = vpack.c.bf16 %v288_v1, %v287_v0  ;;  %s2902_s12 = smov 64   ;;  %s2903_s13 = smov 32   ;;  %vm431_vm2 = vcmask 519424   ;;  %vm441_vm3 = vcmask 781824   ;;  %vm453_vm4 = vcmask 1044224  }
   0xf   : > { %s4367_s25 = smov (!%p269_p3, %s2680_s25), 1  ;;  %s2904_s14 = smov 33   ;;  %vm989_vm5 = vcmask 7168   ;;  %vm1106_vm6 = vcmask 1039360   ;;  %vm801_vm7 = vcmask 261120   ;;  %vm1294_vm8 = vcmask 785408  }
  0x10   : > { %2752 = vmatprep.subr.bf16.mxu0 %v2751_v2  ;;  %2851 = vmatprep.subr.bf16.mxu1 %v2751_v2  ;;  %s2723_s30 = sshll.u32 %s4367_s25, 6  ;;  %s2905_s15 = smov 1   ;;  %vm719_vm9 = vcmask 269312   ;;  %vm1212_vm10 = vcmask 793600   ;;  %vm907_vm11 = vcmask 252928   ;;  %vm1400_vm12 = vcmask 777216  }
  0x11   : > { %2754 = vmatpush3.bf16.msra.mxu0 %v2751_v2  ;;  %2852 = vmatpush3.bf16.msra.mxu1 %v2751_v2  ;;  %s273_s10 = scalar_lea.vmem %s4229_s0, %s2723_s30  ;;  %s2906_s16 = smov 127   ;;  %vm1517_vm13 = vcmask 1043456   ;;  %vm1513_vm14 = vcmask 293888   ;;  %vm2321_vm15 = vcmask 588800  }
  0x12   : > { %v279_v3 = vld [vmem:[%s273_s10] sm:$0xff]  ;;  %v285_v4 = vld [vmem:[%s273_s10 + $0x30] sm:$0xff]  ;;  %v280_v5 = vld [vmem:[%s273_s10 + $0x8] sm:$0xff]  ;;  %s2907_s17 = smov 31   ;;  %s2908_s18 = smov 97  }
  0x13   : > { %2739 = vmatprep.mubr.msk.f32.mxu0 %vm289_vm0, %v279_v3  ;;  %2748 = vmatprep.mubr.msk.f32.mxu1 %vm289_vm0, %v285_v4  ;;  %v286_v6 = vld [vmem:[%s273_s10 + $0x38] sm:$0xff]  ;;  %v281_v7 = vld [vmem:[%s273_s10 + $0x10] sm:$0xff]  ;;  %v283_v9 = vld [vmem:[%s273_s10 + $0x20] sm:$0xff]  ;;  %s2909_s19 = smov 95   ;;  %s4216_s20 = scalar_lea.vmem %s4236_s7, %s2723_s30 }
  0x14   : > { %2740 = vmatmul.mubr.msk.f32.vlgmr.msra.gmra.mrb[0].mxu0 %vm289_vm0, %v280_v5  ;;  %2749 = vmatmul.mubr.msk.f32.vlgmr.msra.gmra.mrb[0].mxu1 %vm289_vm0, %v286_v6  ;;  %v282_v8 = vld [vmem:[%s273_s10 + $0x18] sm:$0xff]  ;;  %v284_v10 = vld [vmem:[%s273_s10 + $0x28] sm:$0xff] }
  0x15   : > { %2742 = vmatprep.mubr.msk.f32.mxu0 %vm289_vm0, %v281_v7 }
  0x18   : > { %2743 = vmatmul.mubr.msk.f32.gmra.mrb[2].mxu0 %vm289_vm0, %v282_v8 }
  0x19   : > { %2745 = vmatprep.mubr.msk.f32.mxu0 %vm289_vm0, %v283_v9 }
  0x1c   : > { %2746 = vmatmul.mubr.msk.f32.gmra.mrb[4].mxu0 %vm289_vm0, %v284_v10 }
  0xe7   : > { %v2741_v11 = vpop.f32.mrb[0].mxu0  ;;  %v2750_v12 = vpop.f32.mrb[0].mxu1 }
  0xe8   : > { %v2982_v13 = vmul.f32 0.25, %v2741_v11  ;;  %v2984_v14 = vmul.f32 0.25, %v2750_v12  ;;  %v2986_v15 = vmul.f32 0.75, %v2750_v12  ;;  %v380_v16 = vpop.f32.mrb[1].mxu0  ;;  %v410_v17 = vpop.f32.mrb[1].mxu1  ;;  %v455_v20 = vmul.f32 0.75, %v2741_v11 }
  0xe9   : > { %420 = vst.msk [vmem:[#allocation2] sm:$0xf] %vm419_vm1, %v380_v16  ;;  %v2989_v18 = vmul.f32 0.75, %v380_v16  ;;  %v604_v19 = vmul.f32 0.25, %v410_v17  ;;  %v669_v22 = vcombine.high %v2750_v12, %v2750_v12  ;;  %v2994_v25 = vmul.f32 0.25, %v380_v16 }
  0xea   : > { %v649_v21 = vrot.slane %v2986_v15, 4  ;;  %v445_v23 = vrot.slane %v2982_v13, 4  ;;  %v638_v24 = vrot.slane %v2984_v14, 4  ;;  %v615_v28 = vmul.f32 0.75, %v410_v17 }
  0xeb   : > { %v2744_v26 = vpop.f32.mrb[2].mxu0  ;;  %v434_v27 = vrot.slane %v2989_v18, 4  ;;  %670 = vrot.lane.b32.xlu1 %v669_v22, %s2901_s11  ;;  %v606_v34 = vrot.slane %v604_v19, 4  ;;  %v457_v36 = vrot.slane %v455_v20, 4  ;;  %v424_v10 = vrot.slane %v2994_v25, 4 }
  0xec   : > { %v651_v29 = vadd.f32 %v649_v21, %v604_v19  ;;  %v390_v30 = vpop.f32.mrb[3].mxu0  ;;  %v464_v31 = vadd.f32 %v455_v20, %v445_v23  ;;  %v3001_v35 = vmul.f32 0.25, %v2744_v26  ;;  %v447_v39 = vadd.f32 %v445_v23, %v2989_v18 }
  0xed   : > { %v2998_v32 = vmul.f32 0.25, %v390_v30  ;;  %v436_v33 = vadd.f32 %v434_v27, %v2994_v25  ;;  %v640_v40 = vadd.f32 %v638_v24, %v615_v28  ;;  %v617_v42 = vrot.slane %v615_v28, 4 }
  0xee   : > { %v487_v44 = vmul.f32 0.75, %v390_v30  ;;  %v624_v46 = vadd.f32 %v615_v28, %v606_v34  ;;  %v470_v48 = vadd.f32 %v457_v36, %v2982_v13  ;;  %v510_v49 = vrot.slane %v3001_v35, 4 }
  0xef   : > { %v478_v37 = vrot.slane %v2998_v32, 4  ;;  %438 = vrot.lane.b32.xlu0 %v436_v33, %s2902_s12  ;;  %v2747_v38 = vpop.f32.mrb[4].mxu0  ;;  %466 = vrot.lane.b32.xlu1 %v464_v31, %s2903_s13  ;;  %v519_v50 = vmul.f32 0.75, %v2744_v26  ;;  %v630_v56 = vadd.f32 %v617_v42, %v604_v19  ;;  %v656_v60 = vadd.f32 %v2986_v15, %v638_v24 }
  0xf0   : > { %v3007_v41 = vmul.f32 0.75, %v2747_v38  ;;  %v400_v43 = vpop.f32.mrb[5].mxu0  ;;  %v3009_v45 = vmul.f32 0.25, %v2747_v38  ;;  %v512_v54 = vadd.f32 %v510_v49, %v487_v44  ;;  %v489_v57 = vrot.slane %v487_v44, 4 }
  0xf1   : > { %v480_v47 = vadd.f32 %v478_v37, %v455_v20  ;;  %v3017_v52 = vmul.f32 0.25, %v400_v43  ;;  %v3019_v53 = vmul.f32 0.75, %v400_v43  ;;  %v459_v62 = vadd.f32 %v457_v36, %v2994_v25 }
  0xf2   : > { %v574_v51 = vrot.slane %v3009_v45, 4  ;;  %v608_v55 = vadd.f32 %v606_v34, %v3007_v41  ;;  %v521_v63 = vrot.slane %v519_v50, 4  ;;  %v585_v0 = vrot.slane %v3007_v41, 4 }
  0xf3   : > { %626 = vrot.lane.b32.xlu0 %v624_v46, %s2903_s13  ;;  %472 = vrot.lane.b32.xlu1 %v470_v48, %s2902_s12  ;;  %v542_v58 = vrot.slane %v3017_v52, 4  ;;  %v553_v61 = vrot.slane %v3019_v53, 4  ;;  %v461_v2 = vcombine.high %v459_v62, %v459_v62  ;;  %v619_v3 = vadd.f32 %v617_v42, %v3009_v45 }
  0xf4   : > { %v576_v59 = vadd.f32 %v574_v51, %v3019_v53  ;;  %v653_v4 = vcombine.high %v651_v29, %v651_v29  ;;  %v449_v5 = vcombine.high %v447_v39, %v447_v39  ;;  %v523_v6 = vadd.f32 %v521_v63, %v2998_v32 }
  0xf5   : > { %v544_v1 = vadd.f32 %v542_v58, %v519_v50  ;;  %v491_v7 = vadd.f32 %v489_v57, %v2982_v13  ;;  %v587_v8 = vadd.f32 %v585_v0, %v3017_v52  ;;  %v662_v9 = vadd.f32 %v649_v21, %v2984_v14  ;;  %463 = vst.msk [vmem:[#allocation2 + $0x4] sm:$0xf] %vm419_vm1, %v461_v2 }
  0xf6   : > { %v621_v11 = vcombine.high %v619_v3, %v619_v3  ;;  %655 = vst.msk [vmem:[#allocation2 + $0x1c] sm:$0xf] %vm419_vm1, %v653_v4  ;;  %v555_v12 = vadd.f32 %v553_v61, %v3001_v35  ;;  %v525_v15 = vcombine.high %v523_v6, %v523_v6  ;;  %v642_v14 = vcombine.high %v640_v40, %v640_v40 }
  0xf7   : > { %632 = vrot.lane.b32.xlu0 %v630_v56, %s2902_s12  ;;  %658 = vrot.lane.b32.xlu1 %v656_v60, %s2903_s13  ;;  %v493_v16 = vcombine.high %v491_v7, %v491_v7  ;;  %v589_v17 = vcombine.high %v587_v8, %v587_v8  ;;  %v426_v19 = vadd.f32 %v424_v10, %v2989_v18  ;;  %v3218_v8 = vld [vmem:[%s4231_s2 + $0x38] sm:$0xff] }
  0xf8   : > { %623 = vst.msk [vmem:[#allocation2 + $0x18] sm:$0xf] %vm419_vm1, %v621_v11  ;;  %v557_v13 = vcombine.high %v555_v12, %v555_v12  ;;  %527 = vst.msk [vmem:[#allocation2 + $0xc] sm:$0xf] %vm419_vm1, %v525_v15  ;;  %v528_v20 = vadd.f32 %v519_v50, %v510_v49  ;;  %v534_v21 = vadd.f32 %v521_v63, %v3001_v35  ;;  %v3237_v15 = vld [vmem:[%s4231_s2 + $0x30] sm:$0xff] }
  0xf9   : > { %495 = vst.msk [vmem:[#allocation2 + $0x8] sm:$0xf] %vm419_vm1, %v493_v16  ;;  %591 = vst.msk [vmem:[#allocation2 + $0x14] sm:$0xf] %vm419_vm1, %v589_v17  ;;  %v496_v22 = vadd.f32 %v487_v44, %v478_v37  ;;  %v482_v23 = vcombine.high %v480_v47, %v480_v47  ;;  %v502_v18 = vadd.f32 %v489_v57, %v2998_v32 }
  0xfa   : > { %559 = vst.msk [vmem:[#allocation2 + $0x10] sm:$0xf] %vm419_vm1, %v557_v13  ;;  %v592_v24 = vadd.f32 %v3007_v41, %v574_v51  ;;  %v514_v25 = vcombine.high %v512_v54, %v512_v54  ;;  %v598_v26 = vadd.f32 %v585_v0, %v3009_v45  ;;  %v560_v27 = vadd.f32 %v3019_v53, %v542_v58 }
  0xfb   : > { %450 = vrot.lane.b32.xlu0 %v449_v5, %s2901_s11  ;;  %664 = vrot.lane.b32.xlu1 %v662_v9, %s2902_s12  ;;  %v610_v28 = vcombine.high %v608_v55, %v608_v55  ;;  %v566_v29 = vadd.f32 %v553_v61, %v3017_v52  ;;  %v546_v30 = vcombine.high %v544_v1, %v544_v1  ;;  %v736_v0 = vlaneseq }
  0xfc   : > { %v578_v31 = vcombine.high %v576_v59, %v576_v59  ;;  %v4237_v1 = vmov 0.0  }
  0xfd   : > { %1677 = vmatprep.mubr.f32.mxu0 %v4237_v1  ;;  %1606 = vmatprep.mubr.f32.mxu1 %v4237_v1  ;;  %v737_v4 = vshrl.u32 %v736_v0, 7 }
  0xff   : > { %643 = vrot.lane.b32.xlu0 %v642_v14, %s2901_s11  ;;  %428 = vrot.lane.b32.xlu1 %v426_v19, %s2903_s13  ;;  %v3213_v7 = vsub.s32 3, %v737_v4  ;;  %v3224_v11 = vsub.s32 5, %v737_v4  ;;  %v3239_v16 = vsub.s32 1, %v737_v4  ;;  %v3243_v14 = vsub.s32 7, %v737_v4 }
 0x101   : > { %v3232_v12 = vrot.slane %v3218_v8, %v3213_v7 }
 0x103   : > { %530 = vrot.lane.b32.xlu0 %v528_v20, %s2903_s13  ;;  %536 = vrot.lane.b32.xlu1 %v534_v21, %s2902_s12  ;;  %4280 = vst [vmem:[#allocation5_spill] sm:$0xff] %v3232_v12  ;;  %v3249_v20 = vrot.slane %v3237_v15, %v3224_v11 }
 0x105   : > { %4281 = vst [vmem:[#allocation6_spill] sm:$0xff] %v3249_v20 }
 0x107   : > { %498 = vrot.lane.b32.xlu0 %v496_v22, %s2903_s13  ;;  %483 = vrot.lane.b32.xlu1 %v482_v23, %s2901_s11  ;;  %v3254_v22 = vrot.slane %v3218_v8, %v3239_v16  ;;  %v3256_v23 = vsub.s32 0, %v737_v4 }
 0x109   : > { %4282 = vst [vmem:[#allocation7_spill] sm:$0xff] %v3254_v22 }
 0x10b   : > { %504 = vrot.lane.b32.xlu0 %v502_v18, %s2902_s12  ;;  %594 = vrot.lane.b32.xlu1 %v592_v24, %s2903_s13 }
 0x10f   : > { %515 = vrot.lane.b32.xlu0 %v514_v25, %s2901_s11  ;;  %600 = vrot.lane.b32.xlu1 %v598_v26, %s2902_s12  ;;  %v3262_v26 = vrot.slane %v3237_v15, %v3243_v14 }
 0x111   : > { %4283 = vst [vmem:[#allocation8_spill] sm:$0xff] %v3262_v26 }
 0x113   : > { %562 = vrot.lane.b32.xlu0 %v560_v27, %s2903_s13  ;;  %611 = vrot.lane.b32.xlu1 %v610_v28, %s2901_s11  ;;  %v1507_v27 = vld [vmem:[%s4234_s5] sm:$0xff] }
 0x117   : > { %568 = vrot.lane.b32.xlu0 %v566_v29, %s2902_s12  ;;  %547 = vrot.lane.b32.xlu1 %v546_v30, %s2901_s11  ;;  %v3272_v30 = vsub.s32 6, %v737_v4 }
 0x11b   : > { %579 = vrot.lane.b32.xlu0 %v578_v31, %s2901_s11  ;;  %v2911_v31 = vmov 0  }
 0x11c   : > { %2872 = vset.pattern.permute.xlu0 %v2911_v31  ;;  %v3342_v31 = vld [vmem:[%s4231_s2 + $0x8] sm:$0xff] }
 0x15d   : > { %v671_v32 = vpop.permute.xlu1 %670 }
 0x161   : > { %v439_v33 = vpop.permute.xlu0 %438  ;;  %v467_v34 = vpop.permute.xlu1 %466 }
 0x162   : > { %469 = vst.msk [vmem:[#allocation2 + $0x4] sm:$0xf] %vm431_vm2, %v467_v34  ;;  %v3278_v34 = vrot.slane %v3218_v8, %v3256_v23 }
 0x164   : > { %4284 = vst [vmem:[#allocation9_spill] sm:$0xff] %v3278_v34 }
 0x165   : > { %v627_v35 = vpop.permute.xlu0 %626  ;;  %v473_v36 = vpop.permute.xlu1 %472 }
 0x166   : > { %629 = vst.msk [vmem:[#allocation2 + $0x18] sm:$0xf] %vm431_vm2, %v627_v35  ;;  %v3280_v35 = vsub.s32 2, %v737_v4 }
 0x167   : > { %475 = vst.msk [vmem:[#allocation2 + $0x4] sm:$0xf] %vm441_vm3, %v473_v36 }
 0x169   : > { %v633_v37 = vpop.permute.xlu0 %632  ;;  %v659_v38 = vpop.permute.xlu1 %658 }
 0x16a   : > { %635 = vst.msk [vmem:[#allocation2 + $0x18] sm:$0xf] %vm441_vm3, %v633_v37 }
 0x16b   : > { %661 = vst.msk [vmem:[#allocation2 + $0x1c] sm:$0xf] %vm431_vm2, %v659_v38 }
 0x16d   : > { %v451_v39 = vpop.permute.xlu0 %450  ;;  %v665_v40 = vpop.permute.xlu1 %664 }
 0x16e   : > { %667 = vst.msk [vmem:[#allocation2 + $0x1c] sm:$0xf] %vm441_vm3, %v665_v40 }
 0x16f   : > { %673 = vst.msk [vmem:[#allocation2 + $0x1c] sm:$0xf] %vm453_vm4, %v671_v32 }
 0x171   : > { %v644_v41 = vpop.permute.xlu0 %643  ;;  %v429_v42 = vpop.permute.xlu1 %428 }
 0x172   : > { %646 = vst.msk [vmem:[#allocation2 + $0x18] sm:$0xf] %vm453_vm4, %v644_v41 }
 0x173   : > { %432 = vst.msk [vmem:[#allocation2] sm:$0xf] %vm431_vm2, %v429_v42  ;;  %v3288_v42 = vrot.slane %v3237_v15, %v3272_v30 }
 0x174   : > { %442 = vst.msk [vmem:[#allocation2] sm:$0xf] %vm441_vm3, %v439_v33 }
 0x175   : > { %454 = vst.msk [vmem:[#allocation2] sm:$0xf] %vm453_vm4, %v451_v39  ;;  %v531_v43 = vpop.permute.xlu0 %530  ;;  %v537_v44 = vpop.permute.xlu1 %536  ;;  %4285 = vst [vmem:[#allocation10_spill] sm:$0xff] %v3288_v42 }
 0x176   : > { %533 = vst.msk [vmem:[#allocation2 + $0xc] sm:$0xf] %vm431_vm2, %v531_v43 }
 0x177   : > { %539 = vst.msk [vmem:[#allocation2 + $0xc] sm:$0xf] %vm441_vm3, %v537_v44 }
 0x179   : > { %v499_v45 = vpop.permute.xlu0 %498  ;;  %v3084_v46 = vld [vmem:[#allocation2 + $0x18] sm:$0xff]  ;;  %v484_v47 = vpop.permute.xlu1 %483 }
 0x17a   : > { %501 = vst.msk [vmem:[#allocation2 + $0x8] sm:$0xf] %vm431_vm2, %v499_v45  ;;  %799 = vrot.lane.b32.xlu0 %v3084_v46, %s2903_s13  ;;  %1088 = vst [vmem:[#allocation3 + $0xb0] sm:$0xf] %v3084_v46  ;;  %717 = vrot.lane.b32.xlu1 %v3084_v46, %s2904_s14  ;;  %v3094_v48 = vcombine.high %v3084_v46, %v3084_v46  ;;  %v3294_v45 = vrot.slane %v3218_v8, %v3280_v35 }
 0x17b   : > { %486 = vst.msk [vmem:[#allocation2 + $0x4] sm:$0xf] %vm453_vm4, %v484_v47 }
 0x17c   : > { %1089 = vst [vmem:[#allocation3 + $0xb8] sm:$0xf] %v3094_v48  ;;  %4286 = vst [vmem:[#allocation11_spill] sm:$0xff] %v3294_v45 }
 0x17d   : > { %v505_v49 = vpop.permute.xlu0 %504  ;;  %v595_v50 = vpop.permute.xlu1 %594 }
 0x17e   : > { %507 = vst.msk [vmem:[#allocation2 + $0x8] sm:$0xf] %vm441_vm3, %v505_v49  ;;  %987 = vrot.lane.b32.xlu0 %v3084_v46, %s2905_s15  ;;  %1102 = vrot.lane.b32.xlu1 %v3084_v46, %s2906_s16 }
 0x17f   : > { %597 = vst.msk [vmem:[#allocation2 + $0x14] sm:$0xf] %vm431_vm2, %v595_v50 }
 0x181   : > { %v516_v51 = vpop.permute.xlu0 %515  ;;  %v601_v52 = vpop.permute.xlu1 %600 }
 0x182   : > { %518 = vst.msk [vmem:[#allocation2 + $0x8] sm:$0xf] %vm453_vm4, %v516_v51  ;;  %905 = vrot.lane.b32.xlu0 %v3084_v46, %s2907_s17  ;;  %1290 = vrot.lane.b32.xlu1 %v3084_v46, %s2901_s11  ;;  %v3109_v53 = vld [vmem:[#allocation2] sm:$0xff] }
 0x183   : > { %603 = vst.msk [vmem:[#allocation2 + $0x14] sm:$0xf] %vm441_vm3, %v601_v52  ;;  %1082 = vst [vmem:[#allocation3 + $0x80] sm:$0xf] %v3109_v53  ;;  %v702_v54 = vcombine.high %v3109_v53, %v3109_v53 }
 0x185   : > { %v563_v55 = vpop.permute.xlu0 %562  ;;  %1083 = vst [vmem:[#allocation3 + $0x88] sm:$0xf] %v702_v54  ;;  %v612_v56 = vpop.permute.xlu1 %611 }
 0x186   : > { %565 = vst.msk [vmem:[#allocation2 + $0x10] sm:$0xf] %vm431_vm2, %v563_v55  ;;  %972 = vrot.lane.b32.xlu0 %v3094_v48, %s2905_s15  ;;  %1208 = vrot.lane.b32.xlu1 %v3084_v46, %s2908_s18 }
 0x187   : > { %614 = vst.msk [vmem:[#allocation2 + $0x14] sm:$0xf] %vm453_vm4, %v612_v56 }
 0x189   : > { %v569_v57 = vpop.permute.xlu0 %568  ;;  %v548_v58 = vpop.permute.xlu1 %547 }
 0x18a   : > { %571 = vst.msk [vmem:[#allocation2 + $0x10] sm:$0xf] %vm441_vm3, %v569_v57  ;;  %1104 = vrot.lane.b32.xlu0 %v3094_v48, %s2906_s16  ;;  %784 = vrot.lane.b32.xlu1 %v3094_v48, %s2903_s13 }
 0x18b   : > { %550 = vst.msk [vmem:[#allocation2 + $0xc] sm:$0xf] %vm453_vm4, %v548_v58 }
 0x18d   : > { %v580_v59 = vpop.permute.xlu0 %579 }
 0x18e   : > { %582 = vst.msk [vmem:[#allocation2 + $0x10] sm:$0xf] %vm453_vm4, %v580_v59  ;;  %1292 = vrot.lane.b32.xlu0 %v3094_v48, %s2901_s11  ;;  %696 = vrot.lane.b32.xlu1 %v3094_v48, %s2904_s14 }
 0x192   : > { %1210 = vrot.lane.b32.xlu0 %v3094_v48, %s2908_s18  ;;  %890 = vrot.lane.b32.xlu1 %v3094_v48, %s2907_s17  ;;  %v691_v60 = vld [vmem:[#allocation2 + $0x8] sm:$0xff] }
 0x193   : > { %1084 = vst [vmem:[#allocation3 + $0x90] sm:$0xf] %v691_v60  ;;  %v703_v61 = vcombine.high %v691_v60, %v691_v60 }
 0x195   : > { %v692_v62 = vld [vmem:[#allocation2 + $0x10] sm:$0xff]  ;;  %1085 = vst [vmem:[#allocation3 + $0x98] sm:$0xf] %v703_v61 }
 0x196   : > { %975 = vrot.lane.b32.xlu0 %v3109_v53, %s2905_s15  ;;  %787 = vrot.lane.b32.xlu1 %v3109_v53, %s2903_s13  ;;  %1086 = vst [vmem:[#allocation3 + $0xa0] sm:$0xf] %v692_v62  ;;  %v3140_v63 = vcombine.high %v692_v62, %v692_v62 }
 0x198   : > { %1087 = vst [vmem:[#allocation3 + $0xa8] sm:$0xf] %v3140_v63 }
 0x19a   : > { %1278 = vrot.lane.b32.xlu0 %v3109_v53, %s2901_s11  ;;  %705 = vrot.lane.b32.xlu1 %v3109_v53, %s2904_s14 }
 0x19e   : > { %1196 = vrot.lane.b32.xlu0 %v3109_v53, %s2908_s18  ;;  %893 = vrot.lane.b32.xlu1 %v3109_v53, %s2907_s17 }
 0x1a2   : > { %789 = vrot.lane.b32.xlu0 %v702_v54, %s2903_s13  ;;  %1090 = vrot.lane.b32.xlu1 %v3109_v53, %s2906_s16 }
 0x1a6   : > { %707 = vrot.lane.b32.xlu0 %v702_v54, %s2904_s14  ;;  %977 = vrot.lane.b32.xlu1 %v702_v54, %s2905_s15 }
 0x1aa   : > { %1280 = vrot.lane.b32.xlu0 %v702_v54, %s2901_s11  ;;  %895 = vrot.lane.b32.xlu1 %v702_v54, %s2907_s17 }
 0x1ae   : > { %1092 = vrot.lane.b32.xlu1 %v702_v54, %s2906_s16  ;;  %791 = vrot.lane.b32.xlu0 %v691_v60, %s2903_s13 }
 0x1b2   : > { %1198 = vrot.lane.b32.xlu1 %v702_v54, %s2908_s18  ;;  %979 = vrot.lane.b32.xlu0 %v691_v60, %s2905_s15 }
 0x1b6   : > { %1098 = vrot.lane.b32.xlu1 %v692_v62, %s2906_s16  ;;  %709 = vrot.lane.b32.xlu0 %v691_v60, %s2904_s14 }
 0x1ba   : > { %1286 = vrot.lane.b32.xlu1 %v692_v62, %s2901_s11  ;;  %897 = vrot.lane.b32.xlu0 %v691_v60, %s2907_s17 }
 0x1be   : > { %1282 = vrot.lane.b32.xlu1 %v691_v60, %s2901_s11  ;;  %1094 = vrot.lane.b32.xlu0 %v691_v60, %s2906_s16 }
 0x1c2   : > { %1204 = vrot.lane.b32.xlu1 %v692_v62, %s2908_s18  ;;  %1200 = vrot.lane.b32.xlu0 %v691_v60, %s2908_s18 }
 0x1c6   : > { %1388 = vrot.lane.b32.xlu1 %v691_v60, %s2909_s19  ;;  %1392 = vrot.lane.b32.xlu0 %v692_v62, %s2909_s19 }
 0x1ca   : > { %983 = vrot.lane.b32.xlu1 %v692_v62, %s2905_s15  ;;  %795 = vrot.lane.b32.xlu0 %v692_v62, %s2903_s13 }
 0x1ce   : > { %713 = vrot.lane.b32.xlu0 %v692_v62, %s2904_s14  ;;  %793 = vrot.lane.b32.xlu1 %v703_v61, %s2903_s13 }
 0x1d2   : > { %1386 = vrot.lane.b32.xlu0 %v702_v54, %s2909_s19  ;;  %981 = vrot.lane.b32.xlu1 %v703_v61, %s2905_s15 }
 0x1d6   : > { %1096 = vrot.lane.b32.xlu0 %v703_v61, %s2906_s16  ;;  %711 = vrot.lane.b32.xlu1 %v703_v61, %s2904_s14 }
 0x1da   : > { %1284 = vrot.lane.b32.xlu0 %v703_v61, %s2901_s11  ;;  %899 = vrot.lane.b32.xlu1 %v703_v61, %s2907_s17 }
 0x1de   : > { %1202 = vrot.lane.b32.xlu0 %v703_v61, %s2908_s18  ;;  %901 = vrot.lane.b32.xlu1 %v692_v62, %s2907_s17  ;;  %v3321_v62 = vrot.slane %v3218_v8, %v3243_v14 }
 0x1e0   : > { %4289 = vst [vmem:[#allocation14_spill] sm:$0xff] %v3321_v62 }
 0x1e2   : > { %797 = vrot.lane.b32.xlu0 %v3140_v63, %s2903_s13  ;;  %1390 = vrot.lane.b32.xlu1 %v703_v61, %s2909_s19 }
 0x1e6   : > { %985 = vrot.lane.b32.xlu0 %v3140_v63, %s2905_s15  ;;  %715 = vrot.lane.b32.xlu1 %v3140_v63, %s2904_s14 }
 0x1ea   : > { %903 = vrot.lane.b32.xlu0 %v3140_v63, %s2907_s17  ;;  %1384 = vrot.lane.b32.xlu1 %v3109_v53, %s2909_s19 }
 0x1ec   : > { %v3197_v2 = vpop.permute.xlu0 %799  ;;  %v3199_v3 = vpop.permute.xlu1 %717 }
 0x1ee   : > { %1398 = vrot.lane.b32.xlu0 %v3094_v48, %s2909_s19  ;;  %1288 = vrot.lane.b32.xlu1 %v3140_v63, %s2901_s11 }
 0x1f0   : > { %v3205_v5 = vpop.permute.xlu0 %987  ;;  %v3207_v6 = vpop.permute.xlu1 %1102 }
 0x1f2   : > { %1100 = vrot.lane.b32.xlu0 %v3140_v63, %s2906_s16  ;;  %1396 = vrot.lane.b32.xlu1 %v3084_v46, %s2909_s19  ;;  %v3299_v46 = vld [vmem:[%s4231_s2] sm:$0xff] }
 0x1f3   : > { %v3309_v54 = vrot.slane %v3299_v46, %v3213_v7  ;;  %v3313_v55 = vrot.slane %v3299_v46, %v3239_v16 }
 0x1f4   : > { %v3220_v9 = vpop.permute.xlu0 %905  ;;  %v3222_v10 = vpop.permute.xlu1 %1290 }
 0x1f5   : > { %4287 = vst [vmem:[#allocation12_spill] sm:$0xff] %v3309_v54  ;;  %4288 = vst [vmem:[#allocation13_spill] sm:$0xff] %v3313_v55 }
 0x1f6   : > { %1206 = vrot.lane.b32.xlu0 %v3140_v63, %s2908_s18  ;;  %1394 = vrot.lane.b32.xlu1 %v3140_v63, %s2909_s19  ;;  %v3325_v63 = vrot.slane %v3299_v46, %v3256_v23 }
 0x1f8   : > { %v973_v17 = vpop.permute.xlu0 %972  ;;  %v3241_v13 = vpop.permute.xlu1 %1208  ;;  %4290 = vst [vmem:[#allocation15_spill] sm:$0xff] %v3325_v63 }
 0x1f9   : > { %v996_v19 = vsel %vm989_vm5, %v3205_v5, %v973_v17 }
 0x1fa   : > { %v1045_v21 = vmul.f32 %v3232_v12, %v996_v19  ;;  %1510 = vperm.xlu0 %2872, %v1507_v27  }
 0x1fc   : > { %v1061_v18 = vrot.slane %v1045_v21, 4  ;;  %v3258_v24 = vpop.permute.xlu0 %1104  ;;  %v785_v25 = vpop.permute.xlu1 %784 }
 0x1fd   : > { %v1113_v28 = vsel %vm1106_vm6, %v3207_v6, %v3258_v24  ;;  %v808_v29 = vsel %vm801_vm7, %v3197_v2, %v785_v25 }
 0x1fe   : > { %1077 = vst [vmem:[#allocation3 + $0x78] sm:$0xf0] %v1061_v18  ;;  %v1162_v32 = vmul.f32 %v3249_v20, %v1113_v28  ;;  %v857_v33 = vmul.f32 %v3254_v22, %v808_v29  ;;  %v3333_v28 = vrot.slane %v3218_v8, %v3272_v30  ;;  %v3337_v29 = vrot.slane %v3299_v46, %v3280_v35 }
 0x200   : > { %v1178_v36 = vrot.slane %v1162_v32, 4  ;;  %v873_v37 = vrot.slane %v857_v33, 4  ;;  %v1293_v38 = vpop.permute.xlu0 %1292  ;;  %v697_v39 = vpop.permute.xlu1 %696  ;;  %4291 = vst [vmem:[#allocation16_spill] sm:$0xff] %v3333_v28  ;;  %4292 = vst [vmem:[#allocation17_spill] sm:$0xff] %v3337_v29 }
 0x201   : > { %v1301_v40 = vsel %vm1294_vm8, %v3222_v10, %v1293_v38  ;;  %v726_v41 = vsel %vm719_vm9, %v3199_v3, %v697_v39 }
 0x202   : > { %1194 = vst [vmem:[#allocation3 + $0xb0] sm:$0xf0] %v1178_v36  ;;  %889 = vst [vmem:[#allocation3 + $0x38] sm:$0xf0] %v873_v37  ;;  %v1350_v43 = vmul.f32 %v3262_v26, %v1301_v40  ;;  %v775_v44 = vmul.f32 %v3278_v34, %v726_v41  ;;  %v3350_v41 = vrot.slane %v3342_v31, %v3239_v16 }
 0x204   : > { %v1366_v47 = vrot.slane %v1350_v43, 4  ;;  %783 = vst [vmem:[#allocation3 + $0x38] sm:$0xf] %v775_v44  ;;  %v1211_v48 = vpop.permute.xlu0 %1210  ;;  %v891_v49 = vpop.permute.xlu1 %890  ;;  %v3354_v43 = vrot.slane %v3218_v8, %v3224_v11  ;;  %v3367_v8 = vrot.slane %v3342_v31, %v3213_v7 }
 0x205   : > { %v1219_v50 = vsel %vm1212_vm10, %v3241_v13, %v1211_v48  ;;  %v914_v51 = vsel %vm907_vm11, %v3220_v9, %v891_v49 }
 0x206   : > { %1382 = vst [vmem:[#allocation3 + $0xf0] sm:$0xf0] %v1366_v47  ;;  %v1268_v52 = vmul.f32 %v3288_v42, %v1219_v50  ;;  %v963_v53 = vmul.f32 %v3294_v45, %v914_v51  ;;  %4293 = vst [vmem:[#allocation18_spill] sm:$0xff] %v3354_v43 }
 0x208   : > { %1276 = vst [vmem:[#allocation3 + $0xf0] sm:$0xf] %v1268_v52  ;;  %971 = vst [vmem:[#allocation3 + $0x78] sm:$0xf] %v963_v53  ;;  %v976_v56 = vpop.permute.xlu0 %975  ;;  %v788_v57 = vpop.permute.xlu1 %787  ;;  %v3363_v52 = vrot.slane %v3342_v31, %v3256_v23 }
 0x209   : > { %v1005_v58 = vsel %vm989_vm5, %v973_v17, %v976_v56  ;;  %v817_v59 = vsel %vm801_vm7, %v785_v25, %v788_v57 }
 0x20a   : > { %v1038_v60 = vmul.f32 %v3309_v54, %v1005_v58  ;;  %v850_v61 = vmul.f32 %v3313_v55, %v817_v59 }
 0x20c   : > { %v1054_v0 = vrot.slane %v1038_v60, 4  ;;  %v866_v4 = vrot.slane %v850_v61, 4  ;;  %v1279_v19 = vpop.permute.xlu0 %1278  ;;  %v706_v21 = vpop.permute.xlu1 %705 }
 0x20d   : > { %v1311_v17 = vsel %vm1294_vm8, %v1293_v38, %v1279_v19  ;;  %v735_v18 = vsel %vm719_vm9, %v697_v39, %v706_v21 }
 0x20e   : > { %1070 = vst [vmem:[#allocation3 + $0x40] sm:$0xf0] %v1054_v0  ;;  %882 = vst [vmem:[#allocation3] sm:$0xf0] %v866_v4  ;;  %v1351_v25 = vmul.f32 %v3321_v62, %v1311_v17  ;;  %v768_v27 = vmul.f32 %v3325_v63, %v735_v18  ;;  %v3375_v4 = vrot.slane %v3299_v46, %v3243_v14 }
 0x20f   : > { %v3379_v17 = vrot.slane %v3342_v31, %v3280_v35 }
 0x210   : > { %v1367_v32 = vrot.slane %v1351_v25, 4  ;;  %776 = vst [vmem:[#allocation3] sm:$0xf] %v768_v27  ;;  %v1197_v33 = vpop.permute.xlu0 %1196  ;;  %v894_v36 = vpop.permute.xlu1 %893 }
 0x211   : > { %v1229_v37 = vsel %vm1212_vm10, %v1211_v48, %v1197_v33  ;;  %v923_v38 = vsel %vm907_vm11, %v891_v49, %v894_v36 }
 0x212   : > { %1383 = vst [vmem:[#allocation3 + $0xf8] sm:$0xf0] %v1367_v32  ;;  %v1269_v39 = vmul.f32 %v3333_v28, %v1229_v37  ;;  %v956_v40 = vmul.f32 %v3337_v29, %v923_v38 }
 0x214   : > { %1277 = vst [vmem:[#allocation3 + $0xf8] sm:$0xf] %v1269_v39  ;;  %964 = vst [vmem:[#allocation3 + $0x40] sm:$0xf] %v956_v40  ;;  %v790_v44 = vpop.permute.xlu0 %789  ;;  %v1091_v47 = vpop.permute.xlu1 %1090  ;;  %v3396_v40 = vrot.slane %v3299_v46, %v3224_v11 }
 0x215   : > { %v802_v48 = vsel %vm801_vm7, %v788_v57, %v790_v44  ;;  %v1123_v49 = vsel %vm1106_vm6, %v3258_v24, %v1091_v47 }
 0x216   : > { %v851_v50 = vmul.f32 %v3350_v41, %v802_v48  ;;  %v1163_v51 = vmul.f32 %v3354_v43, %v1123_v49  ;;  %4294 = vst [vmem:[#allocation19_spill] sm:$0xff] %v3396_v40 }
 0x218   : > { %v867_v53 = vrot.slane %v851_v50, 4  ;;  %v1179_v58 = vrot.slane %v1163_v51, 4  ;;  %v708_v59 = vpop.permute.xlu0 %707  ;;  %v978_v60 = vpop.permute.xlu1 %977 }
 0x219   : > { %v720_v57 = vsel %vm719_vm9, %v706_v21, %v708_v59  ;;  %v990_v24 = vsel %vm989_vm5, %v976_v56, %v978_v60  ;;  %v3384_v21 = vld [vmem:[%s4231_s2 + $0x10] sm:$0xff] }
 0x21a   : > { %883 = vst [vmem:[#allocation3 + $0x8] sm:$0xf0] %v867_v53  ;;  %1195 = vst [vmem:[#allocation3 + $0xb8] sm:$0xf0] %v1179_v58  ;;  %v769_v61 = vmul.f32 %v3363_v52, %v720_v57  ;;  %v1039_v0 = vmul.f32 %v3367_v8, %v990_v24  ;;  %v3392_v39 = vrot.slane %v3384_v21, %v3239_v16 }
 0x21b   : > { %v3407_v58 = vrot.slane %v3384_v21, %v3213_v7  ;;  %v3411_v57 = vrot.slane %v3299_v46, %v3272_v30  ;;  %v3422_v46 = vrot.slane %v3384_v21, %v3256_v23 }
 0x21c   : > { %777 = vst [vmem:[#allocation3 + $0x8] sm:$0xf] %v769_v61  ;;  %v1055_v56 = vrot.slane %v1039_v0, 4  ;;  %v1281_v18 = vpop.permute.xlu0 %1280  ;;  %v896_v25 = vpop.permute.xlu1 %895 }
 0x21d   : > { %v1295_v27 = vsel %vm1294_vm8, %v1279_v19, %v1281_v18  ;;  %v908_v32 = vsel %vm907_vm11, %v894_v36, %v896_v25  ;;  %4295 = vst [vmem:[#allocation20_spill] sm:$0xff] %v3407_v58 }
 0x21e   : > { %1071 = vst [vmem:[#allocation3 + $0x48] sm:$0xf0] %v1055_v56  ;;  %v1344_v37 = vmul.f32 %v3375_v4, %v1295_v27  ;;  %v957_v38 = vmul.f32 %v3379_v17, %v908_v32 }
 0x220   : > { %v1360_v48 = vrot.slane %v1344_v37, 4  ;;  %965 = vst [vmem:[#allocation3 + $0x48] sm:$0xf] %v957_v38  ;;  %v3398_v49 = vpop.permute.xlu0 %791  ;;  %v1093_v19 = vpop.permute.xlu1 %1092  ;;  %v1474_v37 = vld [vmem:[#allocation3 + $0x40] sm:$0xff] }
 0x221   : > { %v803_v36 = vsel %vm801_vm7, %v790_v44, %v3398_v49  ;;  %v1107_v50 = vsel %vm1106_vm6, %v1091_v47, %v1093_v19 }
 0x222   : > { %1376 = vst [vmem:[#allocation3 + $0xc0] sm:$0xf0] %v1360_v48  ;;  %v852_v51 = vmul.f32 %v3392_v39, %v803_v36  ;;  %v1156_v53 = vmul.f32 %v3396_v40, %v1107_v50 }
 0x223   : > { %v1467_v38 = vld [vmem:[#allocation3 + $0x8] sm:$0xff] }
 0x224   : > { %v868_v24 = vrot.slane %v852_v51, 4  ;;  %v1172_v61 = vrot.slane %v1156_v53, 4  ;;  %v3413_v0 = vpop.permute.xlu0 %979  ;;  %v1199_v44 = vpop.permute.xlu1 %1198  ;;  %v1466_v51 = vld [vmem:[#allocation3] sm:$0xff] }
 0x225   : > { %v991_v47 = vsel %vm989_vm5, %v978_v60, %v3413_v0  ;;  %v1213_v56 = vsel %vm1212_vm10, %v1197_v33, %v1199_v44 }
 0x226   : > { %884 = vst [vmem:[#allocation3 + $0x10] sm:$0xf0] %v868_v24  ;;  %1188 = vst [vmem:[#allocation3 + $0x80] sm:$0xf0] %v1172_v61  ;;  %v1040_v27 = vmul.f32 %v3407_v58, %v991_v47  ;;  %v1262_v32 = vmul.f32 %v3411_v57, %v1213_v56  ;;  %v2757_v24 = vpack.c.bf16 %v1474_v37, %v1466_v51 }
 0x227   : > { %v1475_v48 = vld [vmem:[#allocation3 + $0x48] sm:$0xff]  ;;  %v3433_v47 = vrot.slane %v3384_v21, %v3280_v35  ;;  %v3444_v37 = vrot.slane %v3342_v31, %v3224_v11 }
 0x228   : > { %v1056_v36 = vrot.slane %v1040_v27, 4  ;;  %1270 = vst [vmem:[#allocation3 + $0xc0] sm:$0xf] %v1262_v32  ;;  %v3424_v50 = vpop.permute.xlu0 %709  ;;  %v3426_v60 = vpop.permute.xlu1 %1098  ;;  %v2755_v33 = vpack.c.bf16 %v1475_v48, %v1467_v38  ;;  %v3448_v38 = vrot.slane %v3342_v31, %v3243_v14 }
 0x229   : > { %v721_v53 = vsel %vm719_vm9, %v708_v59, %v3424_v50  ;;  %4296 = vst [vmem:[#allocation21_spill] sm:$0xff] %v3433_v47  ;;  %4297 = vst [vmem:[#allocation22_spill] sm:$0xff] %v3444_v37 }
 0x22a   : > { %1072 = vst [vmem:[#allocation3 + $0x50] sm:$0xf0] %v1056_v36  ;;  %v770_v61 = vmul.f32 %v3422_v46, %v721_v53  ;;  %2756 = vmatprep.subr.bf16.mxu1 %v2755_v33 }
 0x22b   : > { %2758 = vmatpush1.bf16.msra.mxu1 %v2757_v24  ;;  %v3462_v24 = vrot.slane %v3342_v31, %v3272_v30  ;;  %v3478_v31 = vld [vmem:[%s4231_s2 + $0x18] sm:$0xff] }
 0x22c   : > { %778 = vst [vmem:[#allocation3 + $0x10] sm:$0xf] %v770_v61  ;;  %v3435_v56 = vpop.permute.xlu0 %897  ;;  %v3437_v27 = vpop.permute.xlu1 %1286  ;;  %v3507_v29 = vrot.slane %v3478_v31, %v3213_v7 }
 0x22d   : > { %v909_v32 = vsel %vm907_vm11, %v896_v25, %v3435_v56  ;;  %v1482_v43 = vld [vmem:[#allocation3 + $0x80] sm:$0xff] }
 0x22e   : > { %v958_v59 = vmul.f32 %v3433_v47, %v909_v32  ;;  %4299 = vst [vmem:[#allocation24_spill] sm:$0xff] %v3507_v29 }
 0x230   : > { %966 = vst [vmem:[#allocation3 + $0x50] sm:$0xf] %v958_v59  ;;  %v3450_v48 = vpop.permute.xlu0 %1094  ;;  %v3452_v36 = vpop.permute.xlu1 %1282 }
 0x231   : > { %v1108_v33 = vsel %vm1106_vm6, %v1093_v19, %v3450_v48  ;;  %v1296_v25 = vsel %vm1294_vm8, %v1281_v18, %v3452_v36 }
 0x232   : > { %v1157_v51 = vmul.f32 %v3444_v37, %v1108_v33  ;;  %v1345_v53 = vmul.f32 %v3448_v38, %v1296_v25 }
 0x234   : > { %v1173_v61 = vrot.slane %v1157_v51, 4  ;;  %v1361_v32 = vrot.slane %v1345_v53, 4  ;;  %v3464_v59 = vpop.permute.xlu0 %1200  ;;  %v3466_v1 = vpop.permute.xlu1 %1204  ;;  %v3483_v51 = vld [vmem:[%s4231_s2 + $0x20] sm:$0xff] }
 0x235   : > { %v1214_v19 = vsel %vm1212_vm10, %v1199_v44, %v3464_v59  ;;  %v3541_v55 = vrot.slane %v3483_v51, %v3256_v23 }
 0x236   : > { %1189 = vst [vmem:[#allocation3 + $0x88] sm:$0xf0] %v1173_v61  ;;  %1377 = vst [vmem:[#allocation3 + $0xc8] sm:$0xf0] %v1361_v32  ;;  %v1263_v18 = vmul.f32 %v3462_v24, %v1214_v19  ;;  %v3491_v61 = vrot.slane %v3478_v31, %v3239_v16  ;;  %v3495_v32 = vrot.slane %v3483_v51, %v3239_v16  ;;  %v1490_v19 = vld [vmem:[#allocation3 + $0xc0] sm:$0xff] }
 0x237   : > { %v2761_v45 = vpack.c.bf16 %v1490_v19, %v1482_v43  ;;  %4301 = vst [vmem:[#allocation26_spill] sm:$0xff] %v3541_v55 }
 0x238   : > { %1271 = vst [vmem:[#allocation3 + $0xc8] sm:$0xf] %v1263_v18  ;;  %v3471_v33 = vpop.permute.xlu0 %1392  ;;  %v3473_v25 = vpop.permute.xlu1 %1388  ;;  %4298 = vst [vmem:[#allocation23_spill] sm:$0xff] %v3495_v32 }
 0x23c   : > { %v3485_v44 = vpop.permute.xlu0 %795  ;;  %v3487_v53 = vpop.permute.xlu1 %983 }
 0x23d   : > { %v1483_v18 = vld [vmem:[#allocation3 + $0x88] sm:$0xff] }
 0x23f   : > { %v1491_v28 = vld [vmem:[#allocation3 + $0xc8] sm:$0xff] }
 0x240   : > { %v3497_v42 = vpop.permute.xlu0 %713  ;;  %v794_v26 = vpop.permute.xlu1 %793  ;;  %v2759_v62 = vpack.c.bf16 %v1491_v28, %v1483_v18  ;;  %v3511_v28 = vrot.slane %v3483_v51, %v3213_v7 }
 0x241   : > { %v804_v20 = vsel %vm801_vm7, %v3398_v49, %v794_v26  ;;  %v805_v12 = vsel %vm801_vm7, %v794_v26, %v3485_v44  ;;  %v2698_v26 = vld [vmem:[%s4231_s2 + $0x48] ss:$0 sm:$0xff] }
 0x242   : > { %v853_v40 = vmul.f32 %v3491_v61, %v804_v20  ;;  %v854_v54 = vmul.f32 %v3495_v32, %v805_v12  ;;  %2760 = vmatprep.subr.bf16.mxu1 %v2759_v62  ;;  %4300 = vst [vmem:[#allocation25_spill] sm:$0xff] %v3511_v28  ;;  %v3520_v12 = vrot.slane %v3384_v21, %v3224_v11 }
 0x243   : > { %2762 = vmatpush1.bf16.msra.mxu1 %v2761_v45  ;;  %v3524_v62 = vrot.slane %v3478_v31, %v3224_v11 }
 0x244   : > { %v869_v43 = vrot.slane %v853_v40, 4  ;;  %v870_v49 = vrot.slane %v854_v54, 4  ;;  %v3516_v19 = vpop.permute.xlu0 %1386  ;;  %v982_v20 = vpop.permute.xlu1 %981  ;;  %v3535_v40 = vrot.slane %v3478_v31, %v3256_v23 }
 0x245   : > { %v1402_v45 = vsel %vm1400_vm12, %v3516_v19, %v3473_v25  ;;  %v992_v18 = vsel %vm989_vm5, %v3413_v0, %v982_v20  ;;  %v993_v54 = vsel %vm989_vm5, %v982_v20, %v3487_v53  ;;  %v3545_v0 = vrot.slane %v3384_v21, %v3243_v14 }
 0x246   : > { %885 = vst [vmem:[#allocation3 + $0x18] sm:$0xf0] %v869_v43  ;;  %886 = vst [vmem:[#allocation3 + $0x20] sm:$0xf0] %v870_v49  ;;  %v1451_v32 = vmul.f32 %v2698_v26, %v1402_v45  ;;  %v1041_v37 = vmul.f32 %v3507_v29, %v992_v18  ;;  %v1042_v22 = vmul.f32 %v3511_v28, %v993_v54 }
 0x247   : > { %v3549_v26 = vrot.slane %v3478_v31, %v3243_v14  ;;  %v3553_v43 = vrot.slane %v3478_v31, %v3280_v35 }
 0x248   : > { %1459 = vst [vmem:[#allocation3 + $0x108] sm:$0xf] %v1451_v32  ;;  %v1057_v20 = vrot.slane %v1041_v37, 4  ;;  %v1058_v34 = vrot.slane %v1042_v22, 4  ;;  %v1097_v63 = vpop.permute.xlu0 %1096  ;;  %v712_v47 = vpop.permute.xlu1 %711 }
 0x249   : > { %v1109_v49 = vsel %vm1106_vm6, %v3450_v48, %v1097_v63  ;;  %v1110_v45 = vsel %vm1106_vm6, %v1097_v63, %v3426_v60  ;;  %v722_v37 = vsel %vm719_vm9, %v3424_v50, %v712_v47  ;;  %v723_v22 = vsel %vm719_vm9, %v712_v47, %v3497_v42 }
 0x24a   : > { %1073 = vst [vmem:[#allocation3 + $0x58] sm:$0xf0] %v1057_v20  ;;  %1074 = vst [vmem:[#allocation3 + $0x60] sm:$0xf0] %v1058_v34  ;;  %v1158_v32 = vmul.f32 %v3520_v12, %v1109_v49  ;;  %v1159_v18 = vmul.f32 %v3524_v62, %v1110_v45  ;;  %v771_v54 = vmul.f32 %v3535_v40, %v722_v37  ;;  %v3591_v37 = vld [vmem:[%s4231_s2 + $0x28] sm:$0xff] }
 0x24b   : > { %v772_v28 = vmul.f32 %v3541_v55, %v723_v22  ;;  %v3569_v50 = vrot.slane %v3384_v21, %v3272_v30  ;;  %v3573_v34 = vrot.slane %v3478_v31, %v3272_v30  ;;  %v3586_v31 = vrot.slane %v3483_v51, %v3280_v35  ;;  %v1468_v55 = vld [vmem:[#allocation3 + $0x10] sm:$0xff] }
 0x24c   : > { %v1174_v48 = vrot.slane %v1158_v32, 4  ;;  %v1175_v29 = vrot.slane %v1159_v18, 4  ;;  %779 = vst [vmem:[#allocation3 + $0x18] sm:$0xf] %v771_v54  ;;  %v1285_v63 = vpop.permute.xlu0 %1284  ;;  %v900_v58 = vpop.permute.xlu1 %899 }
 0x24d   : > { %780 = vst [vmem:[#allocation3 + $0x20] sm:$0xf] %v772_v28  ;;  %v1297_v47 = vsel %vm1294_vm8, %v3452_v36, %v1285_v63  ;;  %v1298_v20 = vsel %vm1294_vm8, %v1285_v63, %v3437_v27  ;;  %v910_v49 = vsel %vm907_vm11, %v3435_v56, %v900_v58  ;;  %4302 = vst [vmem:[#allocation27_spill] sm:$0xff] %v3586_v31 }
 0x24e   : > { %1190 = vst [vmem:[#allocation3 + $0x90] sm:$0xf0] %v1174_v48  ;;  %1191 = vst [vmem:[#allocation3 + $0x98] sm:$0xf0] %v1175_v29  ;;  %v1346_v28 = vmul.f32 %v3545_v0, %v1297_v47  ;;  %v1347_v21 = vmul.f32 %v3549_v26, %v1298_v20  ;;  %v959_v45 = vmul.f32 %v3553_v43, %v910_v49 }
 0x24f   : > { %v1499_v36 = vld [vmem:[#allocation3 + $0x108] sm:$0xf]  ;;  %v3604_v63 = vrot.slane %v3237_v15, %v3239_v16 }
 0x250   : > { %v1362_v56 = vrot.slane %v1346_v28, 4  ;;  %v1363_v22 = vrot.slane %v1347_v21, 4  ;;  %967 = vst [vmem:[#allocation3 + $0x58] sm:$0xf] %v959_v45  ;;  %v1203_v29 = vpop.permute.xlu0 %1202  ;;  %2705 = vmatprep.subr.msk.mxu1 %vm1517_vm13, %v1499_v36  ;;  %v3594_v32 = vpop.permute.xlu1 %901  ;;  %v3621_v28 = vld [vmem:[%s4231_s2 + $0x58] ss:$0 sm:$0xff]  ;;  %v3625_v36 = vrot.slane %v3591_v37, %v3213_v7 }
 0x251   : > { %v1215_v18 = vsel %vm1212_vm10, %v3464_v59, %v1203_v29  ;;  %v1216_v54 = vsel %vm1212_vm10, %v1203_v29, %v3466_v1  ;;  %v911_v48 = vsel %vm907_vm11, %v900_v58, %v3594_v32  ;;  %4303 = vst [vmem:[#allocation28_spill] sm:$0xff] %v3604_v63  ;;  %v3611_v59 = vrot.slane %v3591_v37, %v3239_v16  ;;  %v3616_v58 = vld [vmem:[%s4231_s2 + $0x50] ss:$0 sm:$0xff] }
 0x252   : > { %1378 = vst [vmem:[#allocation3 + $0xd0] sm:$0xf0] %v1362_v56  ;;  %1379 = vst [vmem:[#allocation3 + $0xd8] sm:$0xf0] %v1363_v22  ;;  %v1264_v47 = vmul.f32 %v3569_v50, %v1215_v18  ;;  %v1265_v20 = vmul.f32 %v3573_v34, %v1216_v54  ;;  %v960_v49 = vmul.f32 %v3586_v31, %v911_v48  ;;  %v1476_v48 = vld [vmem:[#allocation3 + $0x50] sm:$0xff] }
 0x253   : > { %4304 = vst [vmem:[#allocation29_spill] sm:$0xff] %v3611_v59  ;;  %4305 = vst [vmem:[#allocation30_spill] sm:$0xff] %v3616_v58  ;;  %v3629_v16 = vrot.slane %v3237_v15, %v3213_v7  ;;  %v3633_v56 = vrot.slane %v3591_v37, %v3256_v23  ;;  %v3637_v22 = vrot.slane %v3237_v15, %v3256_v23  ;;  %v1469_v31 = vld [vmem:[#allocation3 + $0x18] sm:$0xff] }
 0x254   : > { %1272 = vst [vmem:[#allocation3 + $0xd0] sm:$0xf] %v1264_v47  ;;  %1273 = vst [vmem:[#allocation3 + $0xd8] sm:$0xf] %v1265_v20  ;;  %v798_v21 = vpop.permute.xlu0 %797  ;;  %v1391_v45 = vpop.permute.xlu1 %1390 }
 0x255   : > { %968 = vst [vmem:[#allocation3 + $0x60] sm:$0xf] %v960_v49  ;;  %v806_v29 = vsel %vm801_vm7, %v3485_v44, %v798_v21  ;;  %v807_v18 = vsel %vm801_vm7, %v798_v21, %v3197_v2  ;;  %v1403_v54 = vsel %vm1400_vm12, %v3473_v25, %v1391_v45  ;;  %v1404_v7 = vsel %vm1400_vm12, %v1391_v45, %v3471_v33 }
 0x256   : > { %v855_v47 = vmul.f32 %v3611_v59, %v806_v29  ;;  %v856_v20 = vmul.f32 %v3604_v63, %v807_v18  ;;  %v1452_v23 = vmul.f32 %v3616_v58, %v1403_v54  ;;  %v1453_v49 = vmul.f32 %v3621_v28, %v1404_v7 }
 0x257   : > { %v1477_v44 = vld [vmem:[#allocation3 + $0x58] sm:$0xff]  ;;  %v3653_v2 = vrot.slane %v3591_v37, %v3280_v35  ;;  %v3657_v25 = vrot.slane %v3237_v15, %v3280_v35  ;;  %v2765_v59 = vpack.c.bf16 %v1476_v48, %v1468_v55 }
 0x258   : > { %v871_v21 = vrot.slane %v855_v47, 4  ;;  %v872_v45 = vrot.slane %v856_v20, 4  ;;  %1460 = vst [vmem:[#allocation3 + $0x110] sm:$0xf] %v1452_v23  ;;  %1461 = vst [vmem:[#allocation3 + $0x118] sm:$0xf] %v1453_v49  ;;  %v986_v29 = vpop.permute.xlu0 %985  ;;  %v716_v18 = vpop.permute.xlu1 %715  ;;  %v2763_v54 = vpack.c.bf16 %v1477_v44, %v1469_v31 }
 0x259   : > { %v994_v7 = vsel %vm989_vm5, %v3487_v53, %v986_v29  ;;  %v995_v63 = vsel %vm989_vm5, %v986_v29, %v3205_v5  ;;  %v724_v58 = vsel %vm719_vm9, %v3497_v42, %v716_v18  ;;  %v725_v15 = vsel %vm719_vm9, %v716_v18, %v3199_v3  ;;  %v3674_v5 = vld [vmem:[%s4231_s2 + $0x40] ss:$0 sm:$0xff]  ;;  %v1485_v42 = vld [vmem:[#allocation3 + $0x98] sm:$0xff]  ;;  %v1484_v3 = vld [vmem:[#allocation3 + $0x90] sm:$0xff] }
 0x25a   : > { %887 = vst [vmem:[#allocation3 + $0x28] sm:$0xf0] %v871_v21  ;;  %888 = vst [vmem:[#allocation3 + $0x30] sm:$0xf0] %v872_v45  ;;  %v1043_v35 = vmul.f32 %v3625_v36, %v994_v7  ;;  %v1044_v47 = vmul.f32 %v3629_v16, %v995_v63  ;;  %v773_v55 = vmul.f32 %v3633_v56, %v724_v58  ;;  %2764 = vmatprep.subr.bf16.mxu0 %v2763_v54 }
 0x25b   : > { %v774_v31 = vmul.f32 %v3637_v22, %v725_v15  ;;  %2766 = vmatpush1.bf16.msra.mxu0 %v2765_v59  ;;  %v1493_v53 = vld [vmem:[#allocation3 + $0xd8] sm:$0xff]  ;;  %v1492_v48 = vld [vmem:[#allocation3 + $0xd0] sm:$0xff]  ;;  %v3684_v29 = vrot.slane %v3483_v51, %v3243_v14 }
 0x25c   : > { %v1059_v20 = vrot.slane %v1043_v35, 4  ;;  %v1060_v23 = vrot.slane %v1044_v47, 4  ;;  %781 = vst [vmem:[#allocation3 + $0x28] sm:$0xf] %v773_v55  ;;  %v904_v63 = vpop.permute.xlu0 %903  ;;  %v1385_v49 = vpop.permute.xlu1 %1384  ;;  %v2767_v58 = vpack.c.bf16 %v1493_v53, %v1485_v42  ;;  %v2769_v44 = vpack.c.bf16 %v1492_v48, %v1484_v3  ;;  %v1481_v15 = vld [vmem:[#allocation3 + $0x78] sm:$0xff]  ;;  %v3715_v48 = vld [vmem:[%s4232_s3] sm:$0xff] }
 0x25d   : > { %782 = vst [vmem:[#allocation3 + $0x30] sm:$0xf] %v774_v31  ;;  %v912_v21 = vsel %vm907_vm11, %v3594_v32, %v904_v63  ;;  %v913_v45 = vsel %vm907_vm11, %v904_v63, %v3220_v9  ;;  %v1401_v59 = vsel %vm1400_vm12, %v1385_v49, %v3516_v19  ;;  %4306 = vst [vmem:[#allocation31_spill] sm:$0xff] %v3684_v29  ;;  %v3696_v9 = vld [vmem:[%s4231_s2 + $0x78] ss:$0 sm:$0xff] }
 0x25e   : > { %1075 = vst [vmem:[#allocation3 + $0x68] sm:$0xf0] %v1059_v20  ;;  %1076 = vst [vmem:[#allocation3 + $0x70] sm:$0xf0] %v1060_v23  ;;  %v961_v18 = vmul.f32 %v3653_v2, %v912_v21  ;;  %v962_v54 = vmul.f32 %v3657_v25, %v913_v45  ;;  %v1450_v7 = vmul.f32 %v3674_v5, %v1401_v59  ;;  %2768 = vmatprep.subr.bf16.mxu0 %v2767_v58  ;;  %v1473_v3 = vld [vmem:[#allocation3 + $0x38] sm:$0xff]  ;;  %v1478_v45 = vld [vmem:[#allocation3 + $0x60] sm:$0xff] }
 0x25f   : > { %v3691_v32 = vrot.slane %v3591_v37, %v3243_v14  ;;  %2770 = vmatpush1.bf16.msra.mxu0 %v2769_v44  ;;  %4308 = vst [vmem:[#allocation33_spill] sm:$0xff] %v3696_v9  ;;  %v1501_v19 = vld [vmem:[#allocation3 + $0x118] sm:$0xf]  ;;  %v3701_v55 = vrot.slane %v3483_v51, %v3224_v11  ;;  %v3705_v14 = vrot.slane %v3591_v37, %v3224_v11  ;;  %v1500_v63 = vld [vmem:[#allocation3 + $0x110] sm:$0xf] }
 0x260   : > { %969 = vst [vmem:[#allocation3 + $0x68] sm:$0xf] %v961_v18  ;;  %970 = vst [vmem:[#allocation3 + $0x70] sm:$0xf] %v962_v54  ;;  %v1399_v35 = vpop.permute.xlu0 %1398  ;;  %2708 = vmatprep.subr.msk.mxu0 %vm1517_vm13, %v1501_v19  ;;  %v1289_v47 = vpop.permute.xlu1 %1288  ;;  %v1489_v59 = vld [vmem:[#allocation3 + $0xb8] sm:$0xff]  ;;  %v3735_v19 = vrot.slane %v3483_v51, %v3272_v30 }
 0x261   : > { %4307 = vst [vmem:[#allocation32_spill] sm:$0xff] %v3691_v32  ;;  %1458 = vst [vmem:[#allocation3 + $0x100] sm:$0xf] %v1450_v7  ;;  %v1417_v31 = vsel %vm1400_vm12, %v1399_v35, %v1385_v49  ;;  %v1299_v42 = vsel %vm1294_vm8, %v3437_v27, %v1289_v47  ;;  %v1300_v53 = vsel %vm1294_vm8, %v1289_v47, %v3222_v10  ;;  %v3724_v10 = vld [vmem:[%s4231_s2 + $0x70] ss:$0 sm:$0xff] }
 0x262   : > { %4309 = vst [vmem:[#allocation34_spill] sm:$0xff] %v3701_v55  ;;  %v1457_v20 = vmul.f32 %v3696_v9, %v1417_v31  ;;  %v1348_v11 = vmul.f32 %v3684_v29, %v1299_v42  ;;  %v1349_v23 = vmul.f32 %v3691_v32, %v1300_v53  ;;  %v2779_v49 = vpack.c.bf16 %v1481_v15, %v1473_v3  ;;  %v3740_v15 = vld [vmem:[%s4231_s2 + $0x60] ss:$0 sm:$0xff]  ;;  %v3745_v47 = vld [vmem:[%s4231_s2 + $0x68] ss:$0 sm:$0xff] }
 0x263   : > { %2709 = vmatpush1.msk.msra.mxu0 %vm1517_vm13, %v1500_v63  ;;  %4310 = vst [vmem:[#allocation35_spill] sm:$0xff] %v3724_v10  ;;  %4311 = vst [vmem:[#allocation36_spill] sm:$0xff] %v3735_v19  ;;  %v4314_v31 = vmov 0.0   ;;  %v3753_v42 = vrot.slane %v3591_v37, %v3272_v30  ;;  %v1471_v53 = vld [vmem:[#allocation3 + $0x28] sm:$0xff] }
 0x264   : > { %1465 = vst [vmem:[#allocation3 + $0x138] sm:$0xf] %v1457_v20  ;;  %v1364_v27 = vrot.slane %v1348_v11, 4  ;;  %v1365_v58 = vrot.slane %v1349_v23, 4  ;;  %v1101_v44 = vpop.permute.xlu0 %1100  ;;  %2780 = vmatprep.subr.bf16.mxu0 %v2779_v49  ;;  %v1397_v21 = vpop.permute.xlu1 %1396  ;;  %2710 = vmatmul.mubr.msk.f32.vlgmr.msra.gmra.mrb[6].mxu0 %vm1513_vm14, %v3715_v48  ;;  %4312 = vst [vmem:[#allocation37_spill] sm:$0xff] %v3740_v15  ;;  %v1472_v3 = vld [vmem:[#allocation3 + $0x30] sm:$0xff] }
 0x265   : > { %v1111_v18 = vsel %vm1106_vm6, %v3426_v60, %v1101_v44  ;;  %v1112_v54 = vsel %vm1106_vm6, %v1101_v44, %v3207_v6  ;;  %v1407_v7 = vsel %vm1400_vm12, %v1397_v21, %v1399_v35  ;;  %4313 = vst [vmem:[#allocation38_spill] sm:$0xff] %v3745_v47  ;;  %v1497_v60 = vld [vmem:[#allocation3 + $0xf8] sm:$0xff]  ;;  %1819 = vmatprep.mubr.f32.mxu0 %v4314_v31  ;;  %4315 = vst [vmem:[#allocation39_spill] sm:$0xff] %v3753_v42  ;;  %v1470_v20 = vld [vmem:[#allocation3 + $0x20] sm:$0xff] }
 0x266   : > { %1380 = vst [vmem:[#allocation3 + $0xe0] sm:$0xf0] %v1364_v27  ;;  %1381 = vst [vmem:[#allocation3 + $0xe8] sm:$0xf0] %v1365_v58  ;;  %v1160_v6 = vmul.f32 %v3701_v55, %v1111_v18  ;;  %v1161_v51 = vmul.f32 %v3705_v14, %v1112_v54  ;;  %v1456_v35 = vmul.f32 %v3724_v10, %v1407_v7 }
 0x267   : > { %v1479_v23 = vld [vmem:[#allocation3 + $0x68] sm:$0xff]  ;;  %v1480_v63 = vld [vmem:[#allocation3 + $0x70] sm:$0xff]  ;;  %v2773_v49 = vpack.c.bf16 %v1478_v45, %v1470_v20  ;;  %v2783_v44 = vpack.c.bf16 %v1497_v60, %v1489_v59 }
 0x268   : > { %v1498_v11 = vld [vmem:[#allocation3 + $0x100] sm:$0xf]  ;;  %v1176_v27 = vrot.slane %v1160_v6, 4  ;;  %v1177_v58 = vrot.slane %v1161_v51, 4  ;;  %1464 = vst [vmem:[#allocation3 + $0x130] sm:$0xf] %v1456_v35  ;;  %v1207_v18 = vpop.permute.xlu0 %1206  ;;  %v1395_v54 = vpop.permute.xlu1 %1394  ;;  %v2771_v7 = vpack.c.bf16 %v1479_v23, %v1471_v53  ;;  %v2781_v9 = vpack.c.bf16 %v1480_v63, %v1472_v3 }
 0x269   : > { %2706 = vmatpush1.msk.msra.mxu1 %vm1517_vm13, %v1498_v11  ;;  %v1217_v30 = vsel %vm1212_vm10, %v3466_v1, %v1207_v18  ;;  %v1218_v37 = vsel %vm1212_vm10, %v1207_v18, %v3241_v13  ;;  %v1405_v10 = vsel %vm1400_vm12, %v3471_v33, %v1395_v54  ;;  %v1406_v45 = vsel %vm1400_vm12, %v1395_v54, %v1397_v21  ;;  %v1496_v13 = vld [vmem:[#allocation3 + $0xf0] sm:$0xff] }
 0x26a   : > { %2707 = vmatmul.mubr.msk.f32.vlgmr.msra.gmra.mrb[2].mxu1 %vm1513_vm14, %v3715_v48  ;;  %1192 = vst [vmem:[#allocation3 + $0xa0] sm:$0xf0] %v1176_v27  ;;  %1193 = vst [vmem:[#allocation3 + $0xa8] sm:$0xf0] %v1177_v58  ;;  %v1266_v59 = vmul.f32 %v3735_v19, %v1217_v30  ;;  %v1267_v60 = vmul.f32 %v3753_v42, %v1218_v37  ;;  %v1454_v6 = vmul.f32 %v3740_v15, %v1405_v10  ;;  %v1488_v33 = vld [vmem:[#allocation3 + $0xb0] sm:$0xff] }
 0x26b   : > { %v1455_v1 = vmul.f32 %v3745_v47, %v1406_v45  ;;  %2772 = vmatprep.subr.bf16.mxu1 %v2771_v7  ;;  %2782 = vmatpush1.bf16.msra.mxu0 %v2781_v9  ;;  %v2785_v21 = vpack.c.bf16 %v1496_v13, %v1488_v33  ;;  %v1505_v51 = vld [vmem:[#allocation3 + $0x138] sm:$0xf] }
 0x26c   : > { %2774 = vmatpush1.bf16.msra.mxu1 %v2773_v49  ;;  %1274 = vst [vmem:[#allocation3 + $0xe0] sm:$0xf] %v1266_v59  ;;  %1275 = vst [vmem:[#allocation3 + $0xe8] sm:$0xf] %v1267_v60  ;;  %2784 = vmatprep.subr.bf16.mxu0 %v2783_v44 }
 0x26d   : > { %1462 = vst [vmem:[#allocation3 + $0x120] sm:$0xf] %v1454_v6  ;;  %1463 = vst [vmem:[#allocation3 + $0x128] sm:$0xf] %v1455_v1  ;;  %1748 = vmatprep.mubr.f32.mxu1 %v4314_v31 }
 0x26f   : > { %2786 = vmatpush1.bf16.msra.mxu0 %v2785_v21  ;;  %v1504_v10 = vld [vmem:[#allocation3 + $0x130] sm:$0xf] }
 0x270   : > { %2714 = vmatprep.subr.msk.mxu0 %vm1517_vm13, %v1505_v51 }
 0x271   : > { %v1487_v35 = vld [vmem:[#allocation3 + $0xa8] sm:$0xff]  ;;  %v1486_v9 = vld [vmem:[#allocation3 + $0xa0] sm:$0xff] }
 0x273   : > { %2715 = vmatpush1.msk.msra.mxu0 %vm1517_vm13, %v1504_v10  ;;  %v1495_v53 = vld [vmem:[#allocation3 + $0xe8] sm:$0xff]  ;;  %v1494_v3 = vld [vmem:[#allocation3 + $0xe0] sm:$0xff] }
 0x274   : > { %2716 = vmatmul.mubr.msk.f32.vlgmr.msra.gmra.mrb[8].mxu0 %vm1513_vm14, %v3715_v48  ;;  %v2775_v20 = vpack.c.bf16 %v1495_v53, %v1487_v35  ;;  %v2777_v11 = vpack.c.bf16 %v1494_v3, %v1486_v9  ;;  %v1503_v23 = vld [vmem:[#allocation3 + $0x128] sm:$0xf]  ;;  %v1502_v63 = vld [vmem:[#allocation3 + $0x120] sm:$0xf] }
 0x275   : > { %2460 = vmatprep.mubr.f32.mxu0 %v4314_v31 }
 0x276   : > { %2776 = vmatprep.subr.bf16.mxu1 %v2775_v20 }
 0x277   : > { %2778 = vmatpush1.bf16.msra.mxu1 %v2777_v11 }
 0x278   : > { %2711 = vmatprep.subr.msk.mxu1 %vm1517_vm13, %v1503_v23 }
 0x279   : > { %v1511_v27 = vpop.permute.xlu0 %1510 }
 0x27b   : > { %2712 = vmatpush1.msk.msra.mxu1 %vm1517_vm13, %v1502_v63 }
 0x27c   : > { %2713 = vmatmul.mubr.msk.f32.vlgmr.msra.gmra.mrb[4].mxu1 %vm1513_vm14, %v3715_v48 }
 0x27d   : > { %2389 = vmatprep.mubr.f32.mxu1 %v4314_v31 }
 0x337   : > { %v1679_v49 = vpop.f32.mrb[6].mxu0 }
 0x338   : > { %v1681_v44 = vpop.f32.mrb[7].mxu0  ;;  %v1680_v6 = vadd.f32 %v1679_v49, %v1511_v27 }
 0x339   : > { %v1682_v13 = vadd.f32 %v1681_v44, %v1511_v27  ;;  %v2315_v44 = vld [vmem:[%s4235_s6] sm:$0xff] }
 0x33a   : > { %v3808_v1 = vmax.f32 %v1680_v6, 0.0 }
 0x33b   : > { %v3830_v33 = vmax.f32 %v1682_v13, 0.0 }
 0x33d   : > { %v1608_v58 = vpop.f32.mrb[2].mxu1 }
 0x33e   : > { %v1609_v18 = vadd.f32 %v1608_v58, %v1511_v27  ;;  %v1610_v54 = vpop.f32.mrb[3].mxu1 }
 0x33f   : > { %v1611_v48 = vadd.f32 %v1610_v54, %v1511_v27 }
 0x340   : > { %v3780_v7 = vmax.f32 %v1609_v18, 0.0 }
 0x341   : > { %v3794_v45 = vmax.f32 %v1611_v48, 0.0 }
 0x342   : > { %1894 = vrot.lane.b32.xlu0 %v3780_v7, %s2903_s13  ;;  %1845 = vrot.lane.b32.xlu1 %v3780_v7, %s2904_s14 }
 0x346   : > { %1943 = vrot.lane.b32.xlu0 %v3780_v7, %s2907_s17  ;;  %2095 = vrot.lane.b32.xlu1 %v3780_v7, %s2908_s18 }
 0x347   : > { %v1821_v30 = vpop.f32.mrb[8].mxu0 }
 0x348   : > { %v1823_v37 = vpop.f32.mrb[9].mxu0  ;;  %v1822_v35 = vadd.f32 %v1821_v30, %v1511_v27 }
 0x349   : > { %v1824_v3 = vadd.f32 %v1823_v37, %v1511_v27 }
 0x34a   : > { %1992 = vrot.lane.b32.xlu0 %v3780_v7, %s2905_s15  ;;  %2193 = vrot.lane.b32.xlu1 %v3780_v7, %s2909_s19  ;;  %v3872_v9 = vmax.f32 %v1822_v35, 0.0 }
 0x34b   : > { %v3878_v20 = vmax.f32 %v1824_v3, 0.0 }
 0x34c   : > { %4318 = vst [vmem:[#allocation42_spill] sm:$0xff] %v3872_v9 }
 0x34d   : > { %4319 = vst [vmem:[#allocation43_spill] sm:$0xff] %v3878_v20 }
 0x34e   : > { %2046 = vrot.lane.b32.xlu0 %v3780_v7, %s2906_s16  ;;  %1847 = vrot.lane.b32.xlu1 %v3794_v45, %s2904_s14 }
 0x34f   : > { %v1750_v59 = vpop.f32.mrb[4].mxu1 }
 0x350   : > { %v1752_v60 = vpop.f32.mrb[5].mxu1  ;;  %v1751_v21 = vadd.f32 %v1750_v59, %v1511_v27 }
 0x351   : > { %v1753_v10 = vadd.f32 %v1752_v60, %v1511_v27 }
 0x352   : > { %2144 = vrot.lane.b32.xlu0 %v3780_v7, %s2901_s11  ;;  %1896 = vrot.lane.b32.xlu1 %v3794_v45, %s2903_s13  ;;  %v3844_v51 = vmax.f32 %v1751_v21, 0.0 }
 0x353   : > { %v3866_v53 = vmax.f32 %v1753_v10, 0.0 }
 0x354   : > { %4316 = vst [vmem:[#allocation40_spill] sm:$0xff] %v3844_v51 }
 0x355   : > { %4317 = vst [vmem:[#allocation41_spill] sm:$0xff] %v3866_v53 }
 0x356   : > { %2048 = vrot.lane.b32.xlu0 %v3794_v45, %s2906_s16  ;;  %1945 = vrot.lane.b32.xlu1 %v3794_v45, %s2907_s17 }
 0x35a   : > { %1849 = vrot.lane.b32.xlu0 %v3808_v1, %s2904_s14  ;;  %1994 = vrot.lane.b32.xlu1 %v3794_v45, %s2905_s15 }
 0x35e   : > { %1898 = vrot.lane.b32.xlu0 %v3808_v1, %s2903_s13  ;;  %2097 = vrot.lane.b32.xlu1 %v3794_v45, %s2908_s18 }
 0x362   : > { %1947 = vrot.lane.b32.xlu0 %v3808_v1, %s2907_s17  ;;  %2146 = vrot.lane.b32.xlu1 %v3794_v45, %s2901_s11 }
 0x366   : > { %1996 = vrot.lane.b32.xlu0 %v3808_v1, %s2905_s15  ;;  %2195 = vrot.lane.b32.xlu1 %v3794_v45, %s2909_s19 }
 0x36a   : > { %2099 = vrot.lane.b32.xlu0 %v3808_v1, %s2908_s18  ;;  %2050 = vrot.lane.b32.xlu1 %v3808_v1, %s2906_s16 }
 0x36e   : > { %2148 = vrot.lane.b32.xlu0 %v3808_v1, %s2901_s11  ;;  %1851 = vrot.lane.b32.xlu1 %v3830_v33, %s2904_s14 }
 0x372   : > { %2197 = vrot.lane.b32.xlu0 %v3808_v1, %s2909_s19  ;;  %1900 = vrot.lane.b32.xlu1 %v3830_v33, %s2903_s13 }
 0x376   : > { %2052 = vrot.lane.b32.xlu0 %v3830_v33, %s2906_s16  ;;  %1949 = vrot.lane.b32.xlu1 %v3830_v33, %s2907_s17 }
 0x37a   : > { %1998 = vrot.lane.b32.xlu1 %v3830_v33, %s2905_s15  ;;  %2103 = vrot.lane.b32.xlu0 %v3844_v51, %s2908_s18 }
 0x37e   : > { %2101 = vrot.lane.b32.xlu1 %v3830_v33, %s2908_s18  ;;  %2152 = vrot.lane.b32.xlu0 %v3844_v51, %s2901_s11 }
 0x382   : > { %2150 = vrot.lane.b32.xlu1 %v3830_v33, %s2901_s11  ;;  %1902 = vrot.lane.b32.xlu0 %v3844_v51, %s2903_s13 }
 0x386   : > { %2199 = vrot.lane.b32.xlu1 %v3830_v33, %s2909_s19  ;;  %2201 = vrot.lane.b32.xlu0 %v3844_v51, %s2909_s19 }
 0x38a   : > { %1951 = vrot.lane.b32.xlu0 %v3844_v51, %s2907_s17  ;;  %2054 = vrot.lane.b32.xlu1 %v3844_v51, %s2906_s16 }
 0x38e   : > { %1855 = vrot.lane.b32.xlu0 %v3866_v53, %s2904_s14  ;;  %1853 = vrot.lane.b32.xlu1 %v3844_v51, %s2904_s14 }
 0x392   : > { %1906 = vrot.lane.b32.xlu0 %v3872_v9, %s2903_s13  ;;  %1904 = vrot.lane.b32.xlu1 %v3866_v53, %s2903_s13 }
 0x396   : > { %1835 = vrot.lane.b32.xlu0 %v3878_v20, %s2904_s14  ;;  %1953 = vrot.lane.b32.xlu1 %v3866_v53, %s2907_s17 }
 0x39a   : > { %1940 = vrot.lane.b32.xlu0 %v3878_v20, %s2907_s17  ;;  %1857 = vrot.lane.b32.xlu1 %v3872_v9, %s2904_s14 }
 0x39e   : > { %1955 = vrot.lane.b32.xlu0 %v3872_v9, %s2907_s17  ;;  %1891 = vrot.lane.b32.xlu1 %v3878_v20, %s2903_s13 }
 0x3a2   : > { %2002 = vrot.lane.b32.xlu0 %v3866_v53, %s2905_s15  ;;  %1989 = vrot.lane.b32.xlu1 %v3878_v20, %s2905_s15 }
 0x3a6   : > { %2056 = vrot.lane.b32.xlu0 %v3866_v53, %s2906_s16  ;;  %2000 = vrot.lane.b32.xlu1 %v3844_v51, %s2905_s15 }
 0x3aa   : > { %2107 = vrot.lane.b32.xlu0 %v3872_v9, %s2908_s18  ;;  %2004 = vrot.lane.b32.xlu1 %v3872_v9, %s2905_s15 }
 0x3ae   : > { %2154 = vrot.lane.b32.xlu0 %v3866_v53, %s2901_s11  ;;  %2058 = vrot.lane.b32.xlu1 %v3872_v9, %s2906_s16 }
 0x3b2   : > { %2060 = vrot.lane.b32.xlu0 %v3878_v20, %s2906_s16  ;;  %2105 = vrot.lane.b32.xlu1 %v3866_v53, %s2908_s18 }
 0x3b4   : > { %v3912_v11 = vpop.permute.xlu0 %1894  ;;  %v3914_v23 = vpop.permute.xlu1 %1845 }
 0x3b6   : > { %2158 = vrot.lane.b32.xlu0 %v3878_v20, %s2901_s11  ;;  %2156 = vrot.lane.b32.xlu1 %v3872_v9, %s2901_s11 }
 0x3b8   : > { %v3920_v63 = vpop.permute.xlu0 %1943  ;;  %v3922_v49 = vpop.permute.xlu1 %2095 }
 0x3b9   : > { %4320 = vst [vmem:[#allocation44_spill] sm:$0xff] %v3922_v49 }
 0x3ba   : > { %2205 = vrot.lane.b32.xlu0 %v3872_v9, %s2909_s19  ;;  %2109 = vrot.lane.b32.xlu1 %v3878_v20, %s2908_s18 }
 0x3bc   : > { %v3931_v27 = vpop.permute.xlu0 %1992  ;;  %v3933_v58 = vpop.permute.xlu1 %2193 }
 0x3be   : > { %2318 = vperm.xlu0 %2872, %v2315_v44   ;;  %2203 = vrot.lane.b32.xlu1 %v3866_v53, %s2909_s19 }
 0x3c0   : > { %v3937_v18 = vpop.permute.xlu0 %2046  ;;  %v1848_v54 = vpop.permute.xlu1 %1847 }
 0x3c1   : > { %v1859_v48 = vsel %vm719_vm9, %v3914_v23, %v1848_v54 }
 0x3c2   : > { %2207 = vrot.lane.b32.xlu1 %v3878_v20, %s2909_s19  ;;  %v1876_v60 = vmul.f32 %v1859_v48, %v3363_v52 }
 0x3c4   : > { %v3943_v30 = vpop.permute.xlu0 %2144  ;;  %v1897_v37 = vpop.permute.xlu1 %1896 }
 0x3c5   : > { %4321 = vst [vmem:[#allocation45_spill] sm:$0xff] %v3943_v30  ;;  %v1908_v59 = vsel %vm801_vm7, %v3912_v11, %v1897_v37 }
 0x3c6   : > { %v1925_v6 = vmul.f32 %v1908_v59, %v3350_v41 }
 0x3c8   : > { %v3949_v13 = vpop.permute.xlu0 %2048  ;;  %v1946_v21 = vpop.permute.xlu1 %1945  ;;  %v2787_v10 = vpack.c.bf16 %v1925_v6, %v1876_v60 }
 0x3c9   : > { %v1957_v35 = vsel %vm907_vm11, %v3920_v63, %v1946_v21 }
 0x3ca   : > { %2788 = vmatprep.subr.bf16.mxu1 %v2787_v10  ;;  %v3956_v47 = vmul.f32 %v1957_v35, %v3379_v17 }
 0x3cc   : > { %v1850_v3 = vpop.permute.xlu0 %1849  ;;  %v1995_v44 = vpop.permute.xlu1 %1994 }
 0x3cd   : > { %v2006_v15 = vsel %vm989_vm5, %v3931_v27, %v1995_v44  ;;  %v1860_v32 = vsel %vm719_vm9, %v1848_v54, %v1850_v3 }
 0x3ce   : > { %v3959_v52 = vmul.f32 %v2006_v15, %v3367_v8 }
 0x3d0   : > { %v1899_v41 = vpop.permute.xlu0 %1898  ;;  %v2098_v48 = vpop.permute.xlu1 %2097 }
 0x3d1   : > { %v2111_v60 = vsel %vm1212_vm10, %v3922_v49, %v2098_v48 }
 0x3d2   : > { %v3968_v42 = vmul.f32 %v2111_v60, %v3411_v57  ;;  %v1909_v60 = vsel %vm801_vm7, %v1897_v37, %v1899_v41 }
 0x3d3   : > { %v1926_v37 = vmul.f32 %v1909_v60, %v3392_v39 }
 0x3d4   : > { %v1948_v6 = vpop.permute.xlu0 %1947  ;;  %v2147_v10 = vpop.permute.xlu1 %2146 }
 0x3d5   : > { %v2160_v29 = vsel %vm1294_vm8, %v3943_v30, %v2147_v10 }
 0x3d6   : > { %v3971_v17 = vmul.f32 %v2160_v29, %v3375_v4 }
 0x3d8   : > { %v1997_v15 = vpop.permute.xlu0 %1996  ;;  %v3975_v35 = vpop.permute.xlu1 %2195 }
 0x3d9   : > { %v2007_v55 = vsel %vm989_vm5, %v1995_v44, %v1997_v15 }
 0x3dc   : > { %v2100_v59 = vpop.permute.xlu0 %2099  ;;  %v3977_v19 = vpop.permute.xlu1 %2050 }
 0x3dd   : > { %v2112_v49 = vsel %vm1212_vm10, %v2098_v48, %v2100_v59 }
 0x3de   : > { %v3985_v4 = vmul.f32 %v2112_v49, %v3462_v24 }
 0x3e0   : > { %v2149_v51 = vpop.permute.xlu0 %2148  ;;  %v3980_v53 = vpop.permute.xlu1 %1851 }
 0x3e1   : > { %v2161_v57 = vsel %vm1294_vm8, %v2147_v10, %v2149_v51  ;;  %v1861_v8 = vsel %vm719_vm9, %v1850_v3, %v3980_v53 }
 0x3e2   : > { %v3988_v29 = vmul.f32 %v2161_v57, %v3448_v38  ;;  %v1878_v38 = vmul.f32 %v1861_v8, %v3535_v40  ;;  %v1877_v57 = vmul.f32 %v1860_v32, %v3422_v46 }
 0x3e4   : > { %v3993_v30 = vpop.permute.xlu0 %2197  ;;  %v3995_v48 = vpop.permute.xlu1 %1900  ;;  %v2805_v9 = vpack.c.bf16 %v1926_v37, %v1877_v57  ;;  %v4323_v37 = vld [vmem:[#allocation24_spill] sm:$0xff] }
 0x3e5   : > { %v1910_v24 = vsel %vm801_vm7, %v1899_v41, %v3995_v48  ;;  %v1958_v41 = vsel %vm907_vm11, %v1946_v21, %v1948_v6 }
 0x3e6   : > { %v1927_v49 = vmul.f32 %v1910_v24, %v3491_v61  ;;  %v4322_v61 = vld [vmem:[#allocation20_spill] sm:$0xff]  ;;  %v4324_v24 = vld [vmem:[#allocation21_spill] sm:$0xff] }
 0x3e7   : > { %v2024_v46 = vmul.f32 %v2007_v55, %v4322_v61 }
 0x3e8   : > { %v2053_v20 = vpop.permute.xlu0 %2052  ;;  %v4005_v54 = vpop.permute.xlu1 %1949  ;;  %v2803_v3 = vpack.c.bf16 %v1927_v49, %v1878_v38  ;;  %v1975_v38 = vmul.f32 %v1958_v41, %v4324_v24 }
 0x3e9   : > { %v1959_v39 = vsel %vm907_vm11, %v1948_v6, %v4005_v54 }
 0x3ea   : > { %2804 = vmatprep.subr.bf16.mxu0 %v2803_v3  ;;  %v1976_v8 = vmul.f32 %v1959_v39, %v3553_v43  ;;  %v2809_v21 = vpack.c.bf16 %v2024_v46, %v1975_v38  ;;  %v2064_v43 = vsel %vm1106_vm6, %v3977_v19, %v2053_v20 }
 0x3eb   : > { %2806 = vmatpush1.bf16.msra.mxu0 %v2805_v9  ;;  %v2081_v46 = vmul.f32 %v2064_v43, %v3520_v12 }
 0x3ec   : > { %v4011_v60 = vpop.permute.xlu0 %2103  ;;  %v4013_v40 = vpop.permute.xlu1 %1998 }
 0x3ed   : > { %v2008_v32 = vsel %vm989_vm5, %v1997_v15, %v4013_v40  ;;  %v2813_v43 = vpack.c.bf16 %v2081_v46, %v3808_v1  ;;  %v4064_v46 = vld [vmem:[%s4233_s4] sm:$0xff] }
 0x3ee   : > { %v2025_v44 = vmul.f32 %v2008_v32, %v4323_v37 }
 0x3f0   : > { %v4021_v49 = vpop.permute.xlu0 %2152  ;;  %v2102_v9 = vpop.permute.xlu1 %2101  ;;  %v2807_v57 = vpack.c.bf16 %v2025_v44, %v1976_v8 }
 0x3f1   : > { %v2114_v32 = vsel %vm1212_vm10, %v2102_v9, %v4011_v60  ;;  %v2113_v38 = vsel %vm1212_vm10, %v2100_v59, %v2102_v9 }
 0x3f2   : > { %2808 = vmatprep.subr.bf16.mxu0 %v2807_v57  ;;  %v2131_v57 = vmul.f32 %v2114_v32, %v3573_v34 }
 0x3f3   : > { %2810 = vmatpush1.bf16.msra.mxu0 %v2809_v21 }
 0x3f4   : > { %v4023_v6 = vpop.permute.xlu0 %1902  ;;  %v2151_v3 = vpop.permute.xlu1 %2150 }
 0x3f5   : > { %v2163_v15 = vsel %vm1294_vm8, %v2151_v3, %v4021_v49  ;;  %v2162_v37 = vsel %vm1294_vm8, %v2149_v51, %v2151_v3 }
 0x3f6   : > { %v2180_v44 = vmul.f32 %v2163_v15, %v3549_v26  ;;  %v2130_v26 = vmul.f32 %v2113_v38, %v3569_v50  ;;  %v4325_v15 = vld [vmem:[#allocation30_spill] sm:$0xff] }
 0x3f8   : > { %v4025_v55 = vpop.permute.xlu0 %2201  ;;  %v2200_v61 = vpop.permute.xlu1 %2199  ;;  %v2815_v51 = vpack.c.bf16 %v2180_v44, %v2131_v57  ;;  %v2063_v57 = vsel %vm1106_vm6, %v3949_v13, %v3977_v19 }
 0x3f9   : > { %v2211_v3 = vsel %vm1400_vm12, %v3993_v30, %v2200_v61 }
 0x3fa   : > { %v2228_v50 = vmul.f32 %v4325_v15, %v2211_v3  ;;  %v4330_v15 = vld [vmem:[#allocation28_spill] sm:$0xff] }
 0x3fc   : > { %v4031_v39 = vpop.permute.xlu0 %1951  ;;  %v4033_v41 = vpop.permute.xlu1 %2054 }
 0x3fd   : > { %v2065_v8 = vsel %vm1106_vm6, %v2053_v20, %v4033_v41  ;;  %v2179_v20 = vmul.f32 %v2162_v37, %v3545_v0 }
 0x3fe   : > { %v2082_v24 = vmul.f32 %v2065_v8, %v3524_v62  ;;  %v2212_v62 = vsel %vm1400_vm12, %v2200_v61, %v4025_v55 }
 0x3ff   : > { %v2817_v9 = vpack.c.bf16 %v2179_v20, %v2130_v26 }
 0x400   : > { %v4045_v21 = vpop.permute.xlu0 %1855  ;;  %v4047_v10 = vpop.permute.xlu1 %1853  ;;  %v2811_v12 = vpack.c.bf16 %v2082_v24, %v3830_v33  ;;  %v2229_v33 = vmul.f32 %v3621_v28, %v2212_v62 }
 0x402   : > { %2812 = vmatprep.subr.bf16.mxu0 %v2811_v12 }
 0x403   : > { %2814 = vmatpush1.bf16.msra.mxu0 %v2813_v43 }
 0x404   : > { %v1907_v59 = vpop.permute.xlu0 %1906  ;;  %2816 = vmatprep.subr.bf16.mxu0 %v2815_v51  ;;  %v1905_v34 = vpop.permute.xlu1 %1904  ;;  %v4326_v51 = vld [vmem:[#allocation15_spill] sm:$0xff] }
 0x405   : > { %v1913_v44 = vsel %vm801_vm7, %v1905_v34, %v1907_v59 }
 0x407   : > { %2818 = vmatpush1.bf16.msra.mxu0 %v2817_v9  ;;  %v4328_v9 = vld [vmem:[#allocation13_spill] sm:$0xff] }
 0x408   : > { %v1836_v1 = vpop.permute.xlu0 %1835  ;;  %2412 = vmatprep.subr.mxu0 %v2229_v33  ;;  %v4058_v0 = vpop.permute.xlu1 %1953  ;;  %v4329_v33 = vld [vmem:[#allocation7_spill] sm:$0xff] }
 0x409   : > { %v1874_v8 = vsel %vm719_vm9, %v1836_v1, %v3914_v23  ;;  %v4327_v23 = vld [vmem:[#allocation9_spill] sm:$0xff] }
 0x40a   : > { %v1875_v26 = vmul.f32 %v1874_v8, %v4326_v51  ;;  %v4331_v8 = vld [vmem:[#allocation22_spill] sm:$0xff] }
 0x40b   : > { %2413 = vmatpush1.msra.mxu0 %v2228_v50  ;;  %v1930_v50 = vmul.f32 %v1913_v44, %v4330_v15  ;;  %v4333_v44 = vld [vmem:[#allocation12_spill] sm:$0xff]  ;;  %v1912_v15 = vsel %vm801_vm7, %v4023_v6, %v1905_v34  ;;  %v1862_v34 = vsel %vm719_vm9, %v3980_v53, %v4047_v10  ;;  %v2892_v53 = vld [vmem:[%s4231_s2 + $0x48] ss:$0 sm:$0xff] }
 0x40c   : > { %v1941_v32 = vpop.permute.xlu0 %1940  ;;  %2718 = vmatmul.mubr.msk.f32.vlgmr.msra.gmra.mrb[10].mxu0 %vm2321_vm15, %v4064_v46  ;;  %v1858_v61 = vpop.permute.xlu1 %1857 }
 0x40d   : > { %2602 = vmatprep.mubr.f32.mxu0 %v4314_v31  ;;  %v1864_v28 = vsel %vm719_vm9, %v4045_v21, %v1858_v61  ;;  %v1865_v37 = vsel %vm719_vm9, %v1858_v61, %v1836_v1  ;;  %v1972_v19 = vsel %vm907_vm11, %v1941_v32, %v3920_v63  ;;  %v4334_v63 = vpack.c.bf16 %v3959_v52, %v3956_v47 }
 0x40e   : > { %v1881_v12 = vmul.f32 %v1864_v28, %v3637_v22  ;;  %v1882_v62 = vmul.f32 %v1865_v37, %v4327_v23  ;;  %v2210_v52 = vsel %vm1400_vm12, %v3975_v35, %v3993_v30  ;;  %v2209_v30 = vsel %vm1400_vm12, %v3933_v58, %v3975_v35 }
 0x410   : > { %v1956_v24 = vpop.permute.xlu0 %1955  ;;  %v1892_v38 = vpop.permute.xlu1 %1891  ;;  %v2837_v37 = vpack.c.bf16 %v1930_v50, %v1881_v12 }
 0x411   : > { %v1914_v43 = vsel %vm801_vm7, %v1907_v59, %v1892_v38  ;;  %v1923_v20 = vsel %vm801_vm7, %v1892_v38, %v3912_v11  ;;  %v2062_v11 = vsel %vm1106_vm6, %v3937_v18, %v3949_v13  ;;  %v2080_v38 = vmul.f32 %v2063_v57, %v4331_v8 }
 0x412   : > { %v1924_v3 = vmul.f32 %v1923_v20, %v4328_v9  ;;  %v1931_v1 = vmul.f32 %v1914_v43, %v4329_v33  ;;  %v4332_v43 = vld [vmem:[#allocation17_spill] sm:$0xff] }
 0x413   : > { %v1973_v51 = vmul.f32 %v1972_v19, %v4332_v43  ;;  %v2795_v12 = vpack.c.bf16 %v2080_v38, %v3794_v45  ;;  %v2227_v43 = vmul.f32 %v2892_v53, %v2210_v52  ;;  %v4355_v53 = vld [vmem:[#allocation39_spill] sm:$0xff] }
 0x414   : > { %v2789_v61 = vpack.c.bf16 %v1924_v3, %v1875_v26  ;;  %v2003_v22 = vpop.permute.xlu0 %2002  ;;  %v1990_v28 = vpop.permute.xlu1 %1989  ;;  %v2835_v59 = vpack.c.bf16 %v1931_v1, %v1882_v62  ;;  %v4335_v26 = vld [vmem:[#allocation19_spill] sm:$0xff]  ;;  %v1963_v3 = vsel %vm907_vm11, %v1956_v24, %v1941_v32 }
 0x415   : > { %v2021_v20 = vsel %vm989_vm5, %v1990_v28, %v3931_v27  ;;  %v2079_v62 = vmul.f32 %v2062_v11, %v4335_v26  ;;  %v1962_v27 = vsel %vm907_vm11, %v4058_v0, %v1956_v24  ;;  %v4336_v32 = vld [vmem:[#allocation11_spill] sm:$0xff] }
 0x416   : > { %v2022_v23 = vmul.f32 %v2021_v20, %v4333_v44  ;;  %2790 = vmatpush1.bf16.msra.mxu1 %v2789_v61  ;;  %2836 = vmatprep.subr.bf16.mxu0 %v2835_v59  ;;  %v1979_v19 = vmul.f32 %v1962_v27, %v3657_v25  ;;  %v1980_v24 = vmul.f32 %v1963_v3, %v4336_v32  ;;  %v4337_v61 = vld [vmem:[#allocation5_spill] sm:$0xff]  ;;  %v4344_v27 = vld [vmem:[#allocation6_spill] sm:$0xff] }
 0x417   : > { %2792 = vmatprep.subr.bf16.mxu1 %v4334_v63  ;;  %2838 = vmatpush1.bf16.msra.mxu0 %v2837_v37  ;;  %v2797_v33 = vpack.c.bf16 %v2079_v62, %v3780_v7  ;;  %v4338_v25 = vpack.c.bf16 %v3988_v29, %v3985_v4  ;;  %v2226_v44 = vmul.f32 %v3674_v5, %v2209_v30 }
 0x418   : > { %v2793_v13 = vpack.c.bf16 %v2022_v23, %v1973_v51  ;;  %v2057_v9 = vpop.permute.xlu0 %2056  ;;  %v2001_v57 = vpop.permute.xlu1 %2000  ;;  %v4341_v51 = vpack.c.bf16 %v3971_v17, %v3968_v42 }
 0x419   : > { %v2010_v8 = vsel %vm989_vm5, %v2001_v57, %v2003_v22  ;;  %v2009_v23 = vsel %vm989_vm5, %v4013_v40, %v2001_v57  ;;  %v2066_v40 = vsel %vm1106_vm6, %v4033_v41, %v2057_v9  ;;  %v4343_v57 = vld [vmem:[#allocation25_spill] sm:$0xff] }
 0x41a   : > { %2794 = vmatpush1.bf16.msra.mxu1 %v2793_v13 }
 0x41b   : > { %2796 = vmatprep.subr.bf16.mxu1 %v2795_v12  ;;  %v2026_v12 = vmul.f32 %v2009_v23, %v4343_v57  ;;  %v4359_v23 = vld [vmem:[#allocation10_spill] sm:$0xff] }
 0x41c   : > { %v4106_v1 = vpop.permute.xlu0 %2107  ;;  %v2005_v47 = vpop.permute.xlu1 %2004 }
 0x41d   : > { %v2011_v45 = vsel %vm989_vm5, %v2003_v22, %v2005_v47  ;;  %v2012_v50 = vsel %vm989_vm5, %v2005_v47, %v1990_v28  ;;  %v1863_v28 = vsel %vm719_vm9, %v4047_v10, %v4045_v21  ;;  %v1911_v10 = vsel %vm801_vm7, %v3995_v48, %v4023_v6  ;;  %v4340_v21 = vld [vmem:[#allocation26_spill] sm:$0xff]  ;;  %v4342_v6 = vld [vmem:[#allocation23_spill] sm:$0xff] }
 0x41e   : > { %v2028_v7 = vmul.f32 %v2011_v45, %v3629_v16  ;;  %v2029_v59 = vmul.f32 %v2012_v50, %v4337_v61  ;;  %2798 = vmatpush1.bf16.msra.mxu1 %v2797_v33  ;;  %v4339_v16 = vld [vmem:[#allocation29_spill] sm:$0xff]  ;;  %v1879_v4 = vmul.f32 %v1862_v34, %v4340_v21  ;;  %v1880_v29 = vmul.f32 %v1863_v28, %v3633_v56  ;;  %v4346_v33 = vld [vmem:[#allocation27_spill] sm:$0xff]  ;;  %v4351_v28 = vld [vmem:[#allocation32_spill] sm:$0xff] }
 0x41f   : > { %2800 = vmatprep.subr.bf16.mxu1 %v4338_v25  ;;  %v1929_v11 = vmul.f32 %v1912_v15, %v4339_v16  ;;  %v1961_v22 = vsel %vm907_vm11, %v4031_v39, %v4058_v0  ;;  %v2027_v48 = vmul.f32 %v2010_v8, %v3625_v36  ;;  %v1928_v56 = vmul.f32 %v1911_v10, %v4342_v6  ;;  %v4356_v21 = vld [vmem:[#allocation44_spill] sm:$0xff] }
 0x420   : > { %v2841_v38 = vpack.c.bf16 %v2028_v7, %v1979_v19  ;;  %v2155_v37 = vpop.permute.xlu0 %2154  ;;  %v2059_v20 = vpop.permute.xlu1 %2058  ;;  %v2839_v35 = vpack.c.bf16 %v2029_v59, %v1980_v24  ;;  %v1960_v0 = vsel %vm907_vm11, %v4005_v54, %v4031_v39  ;;  %v1978_v5 = vmul.f32 %v1961_v22, %v3653_v2  ;;  %v4345_v39 = vld [vmem:[#allocation18_spill] sm:$0xff]  ;;  %v4349_v19 = vld [vmem:[#allocation43_spill] sm:$0xff]  ;;  %v4350_v59 = vld [vmem:[#allocation45_spill] sm:$0xff] }
 0x421   : > { %v2067_v63 = vsel %vm1106_vm6, %v2057_v9, %v2059_v20  ;;  %v2819_v26 = vpack.c.bf16 %v1929_v11, %v1880_v29  ;;  %v2821_v13 = vpack.c.bf16 %v1928_v56, %v1879_v4  ;;  %v1977_v47 = vmul.f32 %v1960_v0, %v4346_v33  ;;  %v4347_v9 = vld [vmem:[#allocation34_spill] sm:$0xff]  ;;  %v4353_v11 = vld [vmem:[#allocation40_spill] sm:$0xff]  ;;  %v4361_v56 = vld [vmem:[#allocation31_spill] sm:$0xff] }
 0x422   : > { %2802 = vmatpush1.bf16.msra.mxu1 %v4341_v51  ;;  %2840 = vmatprep.subr.bf16.mxu0 %v2839_v35  ;;  %v2084_v2 = vmul.f32 %v2067_v63, %v3705_v14  ;;  %v2823_v41 = vpack.c.bf16 %v2027_v48, %v1978_v5  ;;  %v2083_v52 = vmul.f32 %v2066_v40, %v4347_v9  ;;  %v4357_v29 = vld [vmem:[#allocation14_spill] sm:$0xff]  ;;  %v4358_v51 = vld [vmem:[#allocation8_spill] sm:$0xff]  ;;  %v4365_v33 = vld [vmem:[#allocation33_spill] sm:$0xff] }
 0x423   : > { %2341 = vmatprep.subr.mxu1 %v2227_v43  ;;  %2842 = vmatpush1.bf16.msra.mxu0 %v2841_v38  ;;  %v2825_v14 = vpack.c.bf16 %v2026_v12, %v1977_v47  ;;  %v2164_v38 = vsel %vm1294_vm8, %v4021_v49, %v2155_v37  ;;  %v4360_v49 = vld [vmem:[#allocation16_spill] sm:$0xff]  ;;  %v4362_v40 = vld [vmem:[#allocation38_spill] sm:$0xff] }
 0x424   : > { %v2061_v42 = vpop.permute.xlu0 %2060  ;;  %v2106_v17 = vpop.permute.xlu1 %2105  ;;  %v2829_v8 = vpack.c.bf16 %v2083_v52, %v4353_v11  ;;  %v2181_v0 = vmul.f32 %v2164_v38, %v4361_v56 }
 0x425   : > { %v2068_v36 = vsel %vm1106_vm6, %v2059_v20, %v2061_v42  ;;  %v2078_v62 = vsel %vm1106_vm6, %v2061_v42, %v3937_v18  ;;  %v4348_v18 = vld [vmem:[#allocation42_spill] sm:$0xff]  ;;  %v2115_v7 = vsel %vm1212_vm10, %v4011_v60, %v2106_v17  ;;  %v2116_v61 = vsel %vm1212_vm10, %v2106_v17, %v4106_v1  ;;  %v4354_v20 = vld [vmem:[#allocation36_spill] sm:$0xff] }
 0x426   : > { %v2085_v54 = vmul.f32 %v2068_v36, %v4344_v27  ;;  %v2086_v3 = vmul.f32 %v2078_v62, %v4345_v39  ;;  %2342 = vmatpush1.msra.mxu1 %v2226_v44  ;;  %v2132_v35 = vmul.f32 %v2115_v7, %v4354_v20  ;;  %v2133_v43 = vmul.f32 %v2116_v61, %v4355_v53  ;;  %v4363_v27 = vld [vmem:[#allocation37_spill] sm:$0xff]  ;;  %v4364_v39 = vld [vmem:[#allocation35_spill] sm:$0xff] }
 0x427   : > { %2717 = vmatmul.mubr.msk.f32.vlgmr.msra.gmra.mrb[6].mxu1 %vm2321_vm15, %v4064_v46  ;;  %2820 = vmatprep.subr.bf16.mxu1 %v2819_v26 }
 0x428   : > { %v2845_v15 = vpack.c.bf16 %v2085_v54, %v4348_v18  ;;  %v2159_v45 = vpop.permute.xlu0 %2158  ;;  %2822 = vmatpush1.bf16.msra.mxu1 %v2821_v13  ;;  %v2157_v50 = vpop.permute.xlu1 %2156  ;;  %v2843_v32 = vpack.c.bf16 %v2086_v3, %v4349_v19  ;;  %2531 = vmatprep.mubr.f32.mxu1 %v4314_v31  ;;  %v4352_v31 = vld [vmem:[#allocation41_spill] sm:$0xff]  ;;  %v2833_v5 = vpack.c.bf16 %v2181_v0, %v2132_v35 }
 0x429   : > { %v2165_v24 = vsel %vm1294_vm8, %v2155_v37, %v2157_v50  ;;  %2824 = vmatprep.subr.bf16.mxu1 %v2823_v41  ;;  %v2176_v30 = vsel %vm1294_vm8, %v2159_v45, %v4350_v59  ;;  %v2166_v34 = vsel %vm1294_vm8, %v2157_v50, %v2159_v45  ;;  %v2827_v16 = vpack.c.bf16 %v2084_v2, %v4352_v31 }
 0x42a   : > { %2844 = vmatprep.subr.bf16.mxu0 %v2843_v32  ;;  %v2182_v25 = vmul.f32 %v2165_v24, %v4351_v28  ;;  %v2184_v22 = vmul.f32 %v2176_v30, %v4357_v29  ;;  %v2183_v44 = vmul.f32 %v2166_v34, %v4358_v51 }
 0x42b   : > { %2846 = vmatpush1.bf16.msra.mxu0 %v2845_v15 }
 0x42c   : > { %2826 = vmatpush1.bf16.msra.mxu1 %v2825_v14  ;;  %v2110_v60 = vpop.permute.xlu1 %2109  ;;  %v2831_v6 = vpack.c.bf16 %v2182_v25, %v2133_v43  ;;  %v2206_v63 = vpop.permute.xlu0 %2205 }
 0x42d   : > { %v2117_v10 = vsel %vm1212_vm10, %v4106_v1, %v2110_v60  ;;  %v2127_v4 = vsel %vm1212_vm10, %v2110_v60, %v4356_v21  ;;  %2828 = vmatprep.subr.bf16.mxu1 %v2827_v16 }
 0x42e   : > { %v2134_v48 = vmul.f32 %v2117_v10, %v4359_v23  ;;  %v2135_v37 = vmul.f32 %v2127_v4, %v4360_v49 }
 0x430   : > { %v2849_v42 = vpack.c.bf16 %v2183_v44, %v2134_v48  ;;  %2830 = vmatpush1.bf16.msra.mxu1 %v2829_v8  ;;  %v2204_v17 = vpop.permute.xlu1 %2203  ;;  %v2847_v1 = vpack.c.bf16 %v2184_v22, %v2135_v37 }
 0x431   : > { %v2214_v26 = vsel %vm1400_vm12, %v2204_v17, %v2206_v63  ;;  %2832 = vmatprep.subr.bf16.mxu1 %v2831_v6  ;;  %v2213_v62 = vsel %vm1400_vm12, %v4025_v55, %v2204_v17 }
 0x432   : > { %v2231_v36 = vmul.f32 %v4362_v40, %v2214_v26  ;;  %2848 = vmatprep.subr.bf16.mxu0 %v2847_v1  ;;  %v2230_v54 = vmul.f32 %v4363_v27, %v2213_v62 }
 0x433   : > { %2850 = vmatpush1.bf16.msra.mxu0 %v2849_v42 }
 0x434   : > { %2834 = vmatpush1.bf16.msra.mxu1 %v2833_v5  ;;  %v2208_v13 = vpop.permute.xlu1 %2207 }
 0x435   : > { %v2215_v57 = vsel %vm1400_vm12, %v2206_v63, %v2208_v13  ;;  %v2225_v12 = vsel %vm1400_vm12, %v2208_v13, %v3933_v58  ;;  %2483 = vmatprep.subr.mxu1 %v2231_v36 }
 0x436   : > { %v2232_v3 = vmul.f32 %v4364_v39, %v2215_v57  ;;  %v2233_v47 = vmul.f32 %v4365_v33, %v2225_v12 }
 0x438   : > { %2484 = vmatpush1.msra.mxu1 %v2230_v54  ;;  %2554 = vmatprep.subr.mxu0 %v2233_v47 }
 0x439   : > { %2719 = vmatmul.mubr.msk.f32.vlgmr.msra.gmra.mrb[8].mxu1 %vm2321_vm15, %v4064_v46  ;;  %2555 = vmatpush1.msra.mxu0 %v2232_v3 }
 0x43a   : > { %2720 = vmatmul.mubr.msk.f32.vlgmr.msra.gmra.mrb[12].mxu0 %vm2321_vm15, %v4064_v46 }
 0x43d   : > { %v2319_v55 = vpop.permute.xlu0 %2318 }
 0x4df   : > { %v2462_v2 = vpop.f32.mrb[10].mxu0 }
 0x4e0   : > { %v2463_v58 = vadd.f32 %v2462_v2, %v2319_v55  ;;  %v2464_v41 = vpop.f32.mrb[11].mxu0 }
 0x4e1   : > { %v2465_v9 = vadd.f32 %v2464_v41, %v2319_v55 }
 0x4e2   : > { %2876 = vtanh.f32 %v2463_v58 }
 0x4e3   : > { %2878 = vtanh.f32 %v2465_v9 }
 0x4ec   : > { %v2877_v52 = vpop.eup %2876 }
 0x4ed   : > { %v2879_v18 = vpop.eup %2878  ;;  %2619 = vst [vmem:[%s4216_s20 + $0x10] sm:$0xff] %v2877_v52 }
 0x4ee   : > { %2620 = vst [vmem:[%s4216_s20 + $0x18] sm:$0xff] %v2879_v18 }
 0x4fa   : > { %v2391_v46 = vpop.f32.mrb[6].mxu1 }
 0x4fb   : > { %v2392_v15 = vadd.f32 %v2391_v46, %v2319_v55  ;;  %v2393_v45 = vpop.f32.mrb[7].mxu1 }
 0x4fc   : > { %v2394_v50 = vadd.f32 %v2393_v45, %v2319_v55 }
 0x4fd   : > { %2880 = vtanh.f32 %v2392_v15 }
 0x4fe   : > { %2882 = vtanh.f32 %v2394_v50 }
 0x507   : > { %v2881_v19 = vpop.eup %2880 }
 0x508   : > { %v2883_v32 = vpop.eup %2882  ;;  %2617 = vst [vmem:[%s4216_s20] sm:$0xff] %v2881_v19 }
 0x509   : > { %2618 = vst [vmem:[%s4216_s20 + $0x8] sm:$0xff] %v2883_v32 }
 0x50c   : > { %v2533_v24 = vpop.f32.mrb[8].mxu1 }
 0x50d   : > { %v2534_v14 = vadd.f32 %v2533_v24, %v2319_v55  ;;  %v2535_v7 = vpop.f32.mrb[9].mxu1  ;;  %v2604_v61 = vpop.f32.mrb[12].mxu0 }
 0x50e   : > { %v2536_v59 = vadd.f32 %v2535_v7, %v2319_v55  ;;  %v2605_v30 = vadd.f32 %v2604_v61, %v2319_v55  ;;  %v2606_v34 = vpop.f32.mrb[13].mxu0 }
 0x50f   : > { %2884 = vtanh.f32 %v2534_v14  ;;  %v2607_v28 = vadd.f32 %v2606_v34, %v2319_v55 }
 0x510   : > { %2886 = vtanh.f32 %v2536_v59 }
 0x511   : > { %2888 = vtanh.f32 %v2605_v30 }
 0x512   : > { %2890 = vtanh.f32 %v2607_v28 }
 0x519   : > { %v2885_v25 = vpop.eup %2884 }
 0x51a   : > { %v2887_v31 = vpop.eup %2886  ;;  %2621 = vst [vmem:[%s4216_s20 + $0x20] sm:$0xff] %v2885_v25 }
 0x51b   : > { %v2889_v16 = vpop.eup %2888  ;;  %2622 = vst [vmem:[%s4216_s20 + $0x28] sm:$0xff] %v2887_v31 }
 0x51c   : > { %v2891_v11 = vpop.eup %2890  ;;  %2623 = vst [vmem:[%s4216_s20 + $0x30] sm:$0xff] %v2889_v16 }
 0x51d   : > { %2624 = vst [vmem:[%s4216_s20 + $0x38] sm:$0xff] %v2891_v11 }
 0x51e PF: > { %s17_s24 = sadd.s32 1, %s2899_s24  }
 0x51f   : > { %p14_p4 = scmp.ge.s32.totalorder %s17_s24, 4  }
 0x521   :  { %16 = sbr.rel (!%p14_p4) target bundleno = 1 (0x1), region = 78 }

</bundles_post_ra>
